<compile_context>
chip_gen: v7x
topology: tpu7x:2x2x1
jax: 0.10.0
libtpu: 0.0.40
codegen_flags: <defaults>
</compile_context>

<pallas_src>
import functools

import jax
import jax.numpy as jnp
from jax import lax
from jax.experimental import pallas as pl
from jax.experimental.pallas import tpu as pltpu

# ---------------- hyper-params (mirror args of the PyTorch module) -----------
N_CLASS = 8
N_ESTIMATION = 8          # c = normalize(prototypes.weight)[:n_estimation]
DIM = 32                  # backbone embedding dim
TEMPERATURE = 0.1
EPSILON = 0.05
SINKHORN_ITERS = 3

B, C, H, W = 8, 4, 16, 16
FEAT = C * H * W          # flattened input features (1024)


# ---------------- single fused kernel ----------------------------------------
def fused_kernel(x1_ref, x2_ref, w_ref, proto_ref, ti_ref, out_ref,
                 *, temperature, epsilon, n_iters):
    # x1_ref/x2_ref: (B, FEAT) f32        flattened views
    # w_ref:         (FEAT, DIM) f32      bias-free linear backbone
    # proto_ref:     (N_ESTIMATION, DIM)  first n_estimation prototype rows
    # ti_ref:        (B, 2) int32         [:,0]=labels (-1 == unlabeled), [:,1]=idx_m
    # out_ref:       (1,) f32 SMEM        scalar loss
    f32 = jnp.float32
    bf16 = jnp.bfloat16
    K = N_ESTIMATION

    t = ti_ref[:, 0:1]                                             # (B, 1)
    idx = ti_ref[:, 1:2]                                           # (B, 1)

    # ---- permutation one-hot => gathers become tiny exact 0/1 MXU matmuls ---
    col_b = lax.broadcasted_iota(jnp.int32, (B, B), 1)
    perm = (col_b == idx).astype(f32)                              # (B, B)

    # ---- label one-hot + valid mask (labels must lie in [-1, K-1]) ----------
    col_k = lax.broadcasted_iota(jnp.int32, (B, K), 1)
    m_onehot = (col_k == jnp.maximum(t, 0)).astype(f32)            # (B, K)
    labeled = t >= 0                                               # (B, 1) bool

    # ---- backbone: two bf16 K=1024 matmuls; mix views in DIM=32 space -------
    # (backbone is linear & bias-free, so backbone((x1+x2[idx])/2) ==
    #  (backbone(x1)+backbone(x2)[idx])/2 exactly.)
    w = w_ref[...].astype(bf16)                                    # (FEAT, DIM)
    h1 = jnp.dot(x1_ref[...].astype(bf16), w, preferred_element_type=f32)
    h2 = jnp.dot(x2_ref[...].astype(bf16), w, preferred_element_type=f32)

    # h1[idx_m] and h2[idx_m] in one (B,B) @ (B,2*DIM) matmul
    h12_g = jnp.dot(perm, jnp.concatenate([h1, h2], axis=1),
                    preferred_element_type=f32)                    # (B, 2*DIM)
    h1m = (h1 + h12_g[:, DIM:]) * 0.5        # = backbone((x1 + x2[idx_m]) / 2)
    h2m = (h2 + h12_g[:, :DIM]) * 0.5        # = backbone((x2 + x1[idx_m]) / 2)

    # ---- F.normalize(dim=-1) for all four views at once ---------------------
    hs = jnp.concatenate([h1, h2, h1m, h2m], axis=0)               # (4B, DIM)
    z = hs * lax.rsqrt(jnp.maximum(
        jnp.sum(hs * hs, axis=-1, keepdims=True), 1e-24))

    # ---- normalized prototypes (only the K rows DMA'd) -----------------------
    p = proto_ref[...]                                             # (K, DIM)
    c = p * lax.rsqrt(jnp.maximum(
        jnp.sum(p * p, axis=-1, keepdims=True), 1e-24))

    # logits = z @ c.T for all four views in a single NT matmul
    logits = lax.dot_general(z, c, (((1,), (1,)), ((), ())),
                             preferred_element_type=f32)           # (4B, K)

    # ---- log-softmax (== log(softmax(logits / T)) of the reference) ---------
    s = logits * (1.0 / temperature)
    s = s - jnp.max(s, axis=-1, keepdims=True)
    logp = s - jnp.log(jnp.sum(jnp.exp(s), axis=-1, keepdims=True))  # (4B, K)

    # ---- Sinkhorn on views 1 & 2, stacked as (2, B, K) -----------------------
    # reference order: leading row(L1)-norm, then n_iters x (col-norm, row-norm)
    e = logits[:2 * B].reshape(2, B, K) * (1.0 / epsilon)
    # per-row max subtraction is exactly cancelled by the first row norm;
    # keeps exp() overflow-safe for any epsilon.
    q = jnp.exp(e - jnp.max(e, axis=-1, keepdims=True))
    q = q / jnp.maximum(jnp.sum(q, axis=2, keepdims=True), 1e-12)
    for _ in range(n_iters):                   # static unroll (n_iters = 3)
        q = q / jnp.maximum(jnp.sum(q, axis=1, keepdims=True), 1e-12)
        q = q / jnp.maximum(jnp.sum(q, axis=2, keepdims=True), 1e-12)

    # rows with a valid label (t >= 0) are replaced by the one-hot target
    q1 = jnp.where(labeled, m_onehot, q[0])
    q2 = jnp.where(labeled, m_onehot, q[1])

    # q1[idx_m] and q2[idx_m] in one tiny matmul
    q12_g = jnp.dot(perm, jnp.concatenate([q1, q2], axis=1),
                    preferred_element_type=f32)                    # (B, 2K)
    q1m = (q1 + q12_g[:, K:]) * 0.5
    q2m = (q2 + q12_g[:, :K]) * 0.5

    # loss pairs match view order [x1, x2, x1m, x2m] of logp:
    #   (q2, logp1), (q1, logp2), (q2m, logp1m), (q1m, logp2m)
    q_all = jnp.concatenate([q2, q1, q2m, q1m], axis=0)            # (4B, K)
    out_ref[0] = -jnp.sum(q_all * logp) * (1.0 / (2.0 * B))


def fused_loss(x1f, x2f, w_backbone, w_proto, ti):
    kernel = functools.partial(
        fused_kernel,
        temperature=TEMPERATURE,
        epsilon=EPSILON,
        n_iters=SINKHORN_ITERS,
    )
    out = pl.pallas_call(
        kernel,
        out_shape=jax.ShapeDtypeStruct((1,), jnp.float32),
        grid=(1,),
        in_specs=[
            pl.BlockSpec((B, FEAT), lambda i: (0, 0)),
            pl.BlockSpec((B, FEAT), lambda i: (0, 0)),
            pl.BlockSpec((FEAT, DIM), lambda i: (0, 0)),
            # only the first N_ESTIMATION prototype rows are ever used
            pl.BlockSpec((N_ESTIMATION, DIM), lambda i: (0, 0)),
            pl.BlockSpec((B, 2), lambda i: (0, 0)),
        ],
        out_specs=pl.BlockSpec(memory_space=pltpu.MemorySpace.SMEM),
        compiler_params=pltpu.CompilerParams(
            dimension_semantics=("arbitrary",)),
    )(x1f, x2f, w_backbone, w_proto, ti)
    return out[0]


# ---------------- full model forward (minimal JAX glue) ----------------------
def model_forward(x1, x2, t, w_backbone, w_proto, idx_m):
    # flatten NCHW -> (B, FEAT); keep f32 everywhere in the wrapper (bf16 casts
    # ride on idle VPU slots inside the kernel, avoiding extra XLA fusions).
    x1f = x1.reshape(B, FEAT)
    x2f = x2.reshape(B, FEAT)
    ti = jnp.stack([t.astype(jnp.int32), idx_m.astype(jnp.int32)], axis=1)
    return fused_loss(x1f, x2f, w_backbone, w_proto.astype(jnp.float32), ti)


if __name__ == "__main__":
    key = jax.random.PRNGKey(0)
    k1, k2, k3, k4, k5, _ = jax.random.split(key, 6)

    x1 = jax.random.normal(k1, (B, C, H, W), dtype=jnp.float32)
    x2 = jax.random.normal(k2, (B, C, H, W), dtype=jnp.float32)
    # labels with some "unlabeled" (-1) entries; must lie in [-1, N_ESTIMATION-1]
    t = jnp.array([0, 1, 2, -1, 3, 4, -1, 5], dtype=jnp.int32)

    # deterministic parameters (synthetic backbone = flatten + linear, no bias)
    w_backbone = jax.random.normal(k3, (FEAT, DIM), dtype=jnp.float32) * 0.02
    w_proto = jax.random.normal(k4, (N_CLASS * 2, DIM), dtype=jnp.float32) * 0.1

    # TODO(synk): torch.randperm draws from torch's global RNG; here the
    # permutation is supplied as a deterministic input instead.
    idx_m = jax.random.permutation(k5, B)

    loss = jax.jit(model_forward)(x1, x2, t, w_backbone, w_proto, idx_m)
    loss = jax.block_until_ready(loss)
    assert jnp.isfinite(loss)
    print("KERNEL_OK")
</pallas_src>

<mosaic_0001>
module attributes {stable_mosaic.version = 11 : i64} {
  func.func @fused_kernel(%arg0: i32, %arg1: memref<8x1024xf32, #tpu.memory_space<vmem>>, %arg2: memref<8x1024xf32, #tpu.memory_space<vmem>>, %arg3: memref<1024x32xf32, #tpu.memory_space<vmem>>, %arg4: memref<8x32xf32, #tpu.memory_space<vmem>>, %arg5: memref<8x2xi32, #tpu.memory_space<vmem>>, %arg6: memref<1xf32, #tpu.memory_space<smem>>) attributes {dimension_semantics = [#tpu.dimension_semantics<arbitrary>], iteration_bounds = array<i64: 1>, scalar_prefetch = 0 : i64, scratch_operands = 0 : i64, tpu.core_type = #tpu.core_type<tc>, window_params = [{pipeline_mode = #tpu.pipeline_mode<synchronous>, transform_indices = @transform_0, window_bounds = array<i64: 8, 1024>}, {pipeline_mode = #tpu.pipeline_mode<synchronous>, transform_indices = @transform_1, window_bounds = array<i64: 8, 1024>}, {pipeline_mode = #tpu.pipeline_mode<synchronous>, transform_indices = @transform_2, window_bounds = array<i64: 1024, 32>}, {transform_indices = @transform_3, window_bounds = array<i64: 8, 32>}, {pipeline_mode = #tpu.pipeline_mode<synchronous>, transform_indices = @transform_4, window_bounds = array<i64: 8, 2>}, {transform_indices = @transform_5, window_bounds = array<i64: 1>}]} {
    %c0 = arith.constant 0 : index
    %c0_0 = arith.constant 0 : index
    %0 = vector.load %arg5[%c0, %c0_0] : memref<8x2xi32, #tpu.memory_space<vmem>>, vector<8x1xi32>
    %c0_1 = arith.constant 0 : index
    %c1 = arith.constant 1 : index
    %1 = vector.load %arg5[%c0_1, %c1] : memref<8x2xi32, #tpu.memory_space<vmem>>, vector<8x1xi32>
    %2 = tpu.iota {dimensions = array<i32: 1>} : vector<8x8xi32>
    %3 = vector.broadcast %1 : vector<8x1xi32> to vector<8x8xi32>
    %4 = arith.cmpi eq, %2, %3 : vector<8x8xi32>
    %5 = arith.extui %4 : vector<8x8xi1> to vector<8x8xi32>
    %6 = arith.sitofp %5 : vector<8x8xi32> to vector<8x8xf32>
    %7 = tpu.iota {dimensions = array<i32: 1>} : vector<8x8xi32>
    %c0_i32 = arith.constant 0 : i32
    %8 = vector.broadcast %c0_i32 : i32 to vector<8x1xi32>
    %9 = arith.maxsi %0, %8 : vector<8x1xi32>
    %10 = vector.broadcast %9 : vector<8x1xi32> to vector<8x8xi32>
    %11 = arith.cmpi eq, %7, %10 : vector<8x8xi32>
    %12 = arith.extui %11 : vector<8x8xi1> to vector<8x8xi32>
    %13 = arith.sitofp %12 : vector<8x8xi32> to vector<8x8xf32>
    %c0_i32_2 = arith.constant 0 : i32
    %14 = vector.broadcast %c0_i32_2 : i32 to vector<8x1xi32>
    %15 = arith.cmpi sge, %0, %14 : vector<8x1xi32>
    %c0_3 = arith.constant 0 : index
    %c0_4 = arith.constant 0 : index
    %16 = vector.load %arg3[%c0_3, %c0_4] : memref<1024x32xf32, #tpu.memory_space<vmem>>, vector<1024x32xf32>
    %17 = arith.truncf %16 : vector<1024x32xf32> to vector<1024x32xbf16>
    %c0_5 = arith.constant 0 : index
    %c0_6 = arith.constant 0 : index
    %18 = vector.load %arg1[%c0_5, %c0_6] : memref<8x1024xf32, #tpu.memory_space<vmem>>, vector<8x1024xf32>
    %19 = arith.truncf %18 : vector<8x1024xf32> to vector<8x1024xbf16>
    %cst = arith.constant dense<0.000000e+00> : vector<8x32xf32>
    %20 = tpu.matmul %19, %17, %cst {dimension_numbers = #tpu.dot_dimension_numbers<[1], [0], [0], [1], [0, 0, 1, 1], [], []>} : vector<8x1024xbf16>, vector<1024x32xbf16>, vector<8x32xf32> -> vector<8x32xf32>
    %c0_7 = arith.constant 0 : index
    %c0_8 = arith.constant 0 : index
    %21 = vector.load %arg2[%c0_7, %c0_8] : memref<8x1024xf32, #tpu.memory_space<vmem>>, vector<8x1024xf32>
    %22 = arith.truncf %21 : vector<8x1024xf32> to vector<8x1024xbf16>
    %cst_9 = arith.constant dense<0.000000e+00> : vector<8x32xf32>
    %23 = tpu.matmul %22, %17, %cst_9 {dimension_numbers = #tpu.dot_dimension_numbers<[1], [0], [0], [1], [0, 0, 1, 1], [], []>} : vector<8x1024xbf16>, vector<1024x32xbf16>, vector<8x32xf32> -> vector<8x32xf32>
    %24 = tpu.concatenate %20, %23 in 1 : vector<8x32xf32>, vector<8x32xf32> -> vector<8x64xf32>
    %cst_10 = arith.constant dense<0.000000e+00> : vector<8x64xf32>
    %25 = tpu.matmul %6, %24, %cst_10 {dimension_numbers = #tpu.dot_dimension_numbers<[1], [0], [0], [1], [0, 0, 1, 1], [], []>} : vector<8x8xf32>, vector<8x64xf32>, vector<8x64xf32> -> vector<8x64xf32>
    %26 = vector.extract_strided_slice %25 {offsets = [0, 32], sizes = [8, 32], strides = [1, 1]} : vector<8x64xf32> to vector<8x32xf32>
    %27 = arith.addf %20, %26 : vector<8x32xf32>
    %cst_11 = arith.constant 5.000000e-01 : f32
    %28 = vector.broadcast %cst_11 : f32 to vector<8x32xf32>
    %29 = arith.mulf %27, %28 : vector<8x32xf32>
    %30 = vector.extract_strided_slice %25 {offsets = [0, 0], sizes = [8, 32], strides = [1, 1]} : vector<8x64xf32> to vector<8x32xf32>
    %31 = arith.addf %23, %30 : vector<8x32xf32>
    %cst_12 = arith.constant 5.000000e-01 : f32
    %32 = vector.broadcast %cst_12 : f32 to vector<8x32xf32>
    %33 = arith.mulf %31, %32 : vector<8x32xf32>
    %34 = tpu.concatenate %20, %23, %29, %33 in 0 : vector<8x32xf32>, vector<8x32xf32>, vector<8x32xf32>, vector<8x32xf32> -> vector<32x32xf32>
    %35 = arith.mulf %34, %34 : vector<32x32xf32>
    %cst_13 = arith.constant dense<0.000000e+00> : vector<32xf32>
    %36 = vector.multi_reduction <add>, %35, %cst_13 [1] : vector<32x32xf32> to vector<32xf32>
    %37 = vector.shape_cast %36 : vector<32xf32> to vector<32x1xf32>
    %cst_14 = arith.constant 1.000000e-24 : f32
    %38 = vector.broadcast %cst_14 : f32 to vector<32x1xf32>
    %39 = arith.maximumf %37, %38 : vector<32x1xf32>
    %40 = math.rsqrt %39 : vector<32x1xf32>
    %41 = vector.broadcast %40 : vector<32x1xf32> to vector<32x32xf32>
    %42 = arith.mulf %34, %41 : vector<32x32xf32>
    %c0_15 = arith.constant 0 : index
    %c0_16 = arith.constant 0 : index
    %43 = vector.load %arg4[%c0_15, %c0_16] : memref<8x32xf32, #tpu.memory_space<vmem>>, vector<8x32xf32>
    %44 = arith.mulf %43, %43 : vector<8x32xf32>
    %cst_17 = arith.constant dense<0.000000e+00> : vector<8xf32>
    %45 = vector.multi_reduction <add>, %44, %cst_17 [1] : vector<8x32xf32> to vector<8xf32>
    %46 = vector.shape_cast %45 : vector<8xf32> to vector<8x1xf32>
    %cst_18 = arith.constant 1.000000e-24 : f32
    %47 = vector.broadcast %cst_18 : f32 to vector<8x1xf32>
    %48 = arith.maximumf %46, %47 : vector<8x1xf32>
    %49 = math.rsqrt %48 : vector<8x1xf32>
    %50 = vector.broadcast %49 : vector<8x1xf32> to vector<8x32xf32>
    %51 = arith.mulf %43, %50 : vector<8x32xf32>
    %cst_19 = arith.constant dense<0.000000e+00> : vector<32x8xf32>
    %52 = tpu.matmul %42, %51, %cst_19 {dimension_numbers = #tpu.dot_dimension_numbers<[1], [1], [0], [0], [0, 0, 1, 0], [], []>} : vector<32x32xf32>, vector<8x32xf32>, vector<32x8xf32> -> vector<32x8xf32>
    %cst_20 = arith.constant 1.000000e+01 : f32
    %53 = vector.broadcast %cst_20 : f32 to vector<32x8xf32>
    %54 = arith.mulf %52, %53 : vector<32x8xf32>
    %cst_21 = arith.constant dense<0xFF800000> : vector<32xf32>
    %55 = vector.multi_reduction <maximumf>, %54, %cst_21 [1] : vector<32x8xf32> to vector<32xf32>
    %56 = vector.shape_cast %55 : vector<32xf32> to vector<32x1xf32>
    %57 = vector.broadcast %56 : vector<32x1xf32> to vector<32x8xf32>
    %58 = arith.subf %54, %57 : vector<32x8xf32>
    %59 = math.exp %58 : vector<32x8xf32>
    %cst_22 = arith.constant dense<0.000000e+00> : vector<32xf32>
    %60 = vector.multi_reduction <add>, %59, %cst_22 [1] : vector<32x8xf32> to vector<32xf32>
    %61 = vector.shape_cast %60 : vector<32xf32> to vector<32x1xf32>
    %62 = math.log %61 : vector<32x1xf32>
    %63 = vector.broadcast %62 : vector<32x1xf32> to vector<32x8xf32>
    %64 = arith.subf %58, %63 : vector<32x8xf32>
    %65 = vector.extract_strided_slice %52 {offsets = [0, 0], sizes = [16, 8], strides = [1, 1]} : vector<32x8xf32> to vector<16x8xf32>
    %66 = vector.shape_cast %65 : vector<16x8xf32> to vector<2x8x8xf32>
    %cst_23 = arith.constant 2.000000e+01 : f32
    %67 = vector.broadcast %cst_23 : f32 to vector<2x8x8xf32>
    %68 = arith.mulf %66, %67 : vector<2x8x8xf32>
    %cst_24 = arith.constant dense<0xFF800000> : vector<2x8xf32>
    %69 = vector.multi_reduction <maximumf>, %68, %cst_24 [2] : vector<2x8x8xf32> to vector<2x8xf32>
    %70 = vector.shape_cast %69 : vector<2x8xf32> to vector<2x8x1xf32>
    %71 = vector.broadcast %70 : vector<2x8x1xf32> to vector<2x8x8xf32>
    %72 = arith.subf %68, %71 : vector<2x8x8xf32>
    %73 = math.exp %72 : vector<2x8x8xf32>
    %cst_25 = arith.constant dense<0.000000e+00> : vector<2x8xf32>
    %74 = vector.multi_reduction <add>, %73, %cst_25 [2] : vector<2x8x8xf32> to vector<2x8xf32>
    %75 = vector.shape_cast %74 : vector<2x8xf32> to vector<2x8x1xf32>
    %cst_26 = arith.constant 9.99999996E-13 : f32
    %76 = vector.broadcast %cst_26 : f32 to vector<2x8x1xf32>
    %77 = arith.maximumf %75, %76 : vector<2x8x1xf32>
    %78 = vector.broadcast %77 : vector<2x8x1xf32> to vector<2x8x8xf32>
    %79 = arith.divf %73, %78 : vector<2x8x8xf32>
    %cst_27 = arith.constant dense<0.000000e+00> : vector<2x8xf32>
    %80 = vector.multi_reduction <add>, %79, %cst_27 [1] : vector<2x8x8xf32> to vector<2x8xf32>
    %81 = vector.shape_cast %80 : vector<2x8xf32> to vector<2x1x8xf32>
    %cst_28 = arith.constant 9.99999996E-13 : f32
    %82 = vector.broadcast %cst_28 : f32 to vector<2x1x8xf32>
    %83 = arith.maximumf %81, %82 : vector<2x1x8xf32>
    %84 = vector.broadcast %83 : vector<2x1x8xf32> to vector<2x8x8xf32>
    %85 = arith.divf %79, %84 : vector<2x8x8xf32>
    %cst_29 = arith.constant dense<0.000000e+00> : vector<2x8xf32>
    %86 = vector.multi_reduction <add>, %85, %cst_29 [2] : vector<2x8x8xf32> to vector<2x8xf32>
    %87 = vector.shape_cast %86 : vector<2x8xf32> to vector<2x8x1xf32>
    %cst_30 = arith.constant 9.99999996E-13 : f32
    %88 = vector.broadcast %cst_30 : f32 to vector<2x8x1xf32>
    %89 = arith.maximumf %87, %88 : vector<2x8x1xf32>
    %90 = vector.broadcast %89 : vector<2x8x1xf32> to vector<2x8x8xf32>
    %91 = arith.divf %85, %90 : vector<2x8x8xf32>
    %cst_31 = arith.constant dense<0.000000e+00> : vector<2x8xf32>
    %92 = vector.multi_reduction <add>, %91, %cst_31 [1] : vector<2x8x8xf32> to vector<2x8xf32>
    %93 = vector.shape_cast %92 : vector<2x8xf32> to vector<2x1x8xf32>
    %cst_32 = arith.constant 9.99999996E-13 : f32
    %94 = vector.broadcast %cst_32 : f32 to vector<2x1x8xf32>
    %95 = arith.maximumf %93, %94 : vector<2x1x8xf32>
    %96 = vector.broadcast %95 : vector<2x1x8xf32> to vector<2x8x8xf32>
    %97 = arith.divf %91, %96 : vector<2x8x8xf32>
    %cst_33 = arith.constant dense<0.000000e+00> : vector<2x8xf32>
    %98 = vector.multi_reduction <add>, %97, %cst_33 [2] : vector<2x8x8xf32> to vector<2x8xf32>
    %99 = vector.shape_cast %98 : vector<2x8xf32> to vector<2x8x1xf32>
    %cst_34 = arith.constant 9.99999996E-13 : f32
    %100 = vector.broadcast %cst_34 : f32 to vector<2x8x1xf32>
    %101 = arith.maximumf %99, %100 : vector<2x8x1xf32>
    %102 = vector.broadcast %101 : vector<2x8x1xf32> to vector<2x8x8xf32>
    %103 = arith.divf %97, %102 : vector<2x8x8xf32>
    %cst_35 = arith.constant dense<0.000000e+00> : vector<2x8xf32>
    %104 = vector.multi_reduction <add>, %103, %cst_35 [1] : vector<2x8x8xf32> to vector<2x8xf32>
    %105 = vector.shape_cast %104 : vector<2x8xf32> to vector<2x1x8xf32>
    %cst_36 = arith.constant 9.99999996E-13 : f32
    %106 = vector.broadcast %cst_36 : f32 to vector<2x1x8xf32>
    %107 = arith.maximumf %105, %106 : vector<2x1x8xf32>
    %108 = vector.broadcast %107 : vector<2x1x8xf32> to vector<2x8x8xf32>
    %109 = arith.divf %103, %108 : vector<2x8x8xf32>
    %cst_37 = arith.constant dense<0.000000e+00> : vector<2x8xf32>
    %110 = vector.multi_reduction <add>, %109, %cst_37 [2] : vector<2x8x8xf32> to vector<2x8xf32>
    %111 = vector.shape_cast %110 : vector<2x8xf32> to vector<2x8x1xf32>
    %cst_38 = arith.constant 9.99999996E-13 : f32
    %112 = vector.broadcast %cst_38 : f32 to vector<2x8x1xf32>
    %113 = arith.maximumf %111, %112 : vector<2x8x1xf32>
    %114 = vector.broadcast %113 : vector<2x8x1xf32> to vector<2x8x8xf32>
    %115 = arith.divf %109, %114 : vector<2x8x8xf32>
    %116 = vector.extract_strided_slice %115 {offsets = [0, 0, 0], sizes = [1, 8, 8], strides = [1, 1, 1]} : vector<2x8x8xf32> to vector<1x8x8xf32>
    %117 = vector.shape_cast %116 : vector<1x8x8xf32> to vector<8x8xf32>
    %118 = vector.shape_cast %15 : vector<8x1xi1> to vector<8x1xi1>
    %119 = vector.broadcast %118 : vector<8x1xi1> to vector<8x8xi1>
    %120 = arith.select %119, %13, %117 : vector<8x8xi1>, vector<8x8xf32>
    %121 = vector.extract_strided_slice %115 {offsets = [1, 0, 0], sizes = [1, 8, 8], strides = [1, 1, 1]} : vector<2x8x8xf32> to vector<1x8x8xf32>
    %122 = vector.shape_cast %121 : vector<1x8x8xf32> to vector<8x8xf32>
    %123 = vector.shape_cast %15 : vector<8x1xi1> to vector<8x1xi1>
    %124 = vector.broadcast %123 : vector<8x1xi1> to vector<8x8xi1>
    %125 = arith.select %124, %13, %122 : vector<8x8xi1>, vector<8x8xf32>
    %126 = tpu.concatenate %120, %125 in 1 : vector<8x8xf32>, vector<8x8xf32> -> vector<8x16xf32>
    %cst_39 = arith.constant dense<0.000000e+00> : vector<8x16xf32>
    %127 = tpu.matmul %6, %126, %cst_39 {dimension_numbers = #tpu.dot_dimension_numbers<[1], [0], [0], [1], [0, 0, 1, 1], [], []>} : vector<8x8xf32>, vector<8x16xf32>, vector<8x16xf32> -> vector<8x16xf32>
    %128 = vector.extract_strided_slice %127 {offsets = [0, 8], sizes = [8, 8], strides = [1, 1]} : vector<8x16xf32> to vector<8x8xf32>
    %129 = arith.addf %120, %128 : vector<8x8xf32>
    %cst_40 = arith.constant 5.000000e-01 : f32
    %130 = vector.broadcast %cst_40 : f32 to vector<8x8xf32>
    %131 = arith.mulf %129, %130 : vector<8x8xf32>
    %132 = vector.extract_strided_slice %127 {offsets = [0, 0], sizes = [8, 8], strides = [1, 1]} : vector<8x16xf32> to vector<8x8xf32>
    %133 = arith.addf %125, %132 : vector<8x8xf32>
    %cst_41 = arith.constant 5.000000e-01 : f32
    %134 = vector.broadcast %cst_41 : f32 to vector<8x8xf32>
    %135 = arith.mulf %133, %134 : vector<8x8xf32>
    %136 = tpu.concatenate %125, %120, %135, %131 in 0 : vector<8x8xf32>, vector<8x8xf32>, vector<8x8xf32>, vector<8x8xf32> -> vector<32x8xf32>
    %137 = arith.mulf %136, %64 : vector<32x8xf32>
    %138 = vector.shape_cast %137 : vector<32x8xf32> to vector<1x32x8xf32>
    %cst_42 = arith.constant dense<0.000000e+00> : vector<1xf32>
    %139 = vector.multi_reduction <add>, %138, %cst_42 [1, 2] : vector<1x32x8xf32> to vector<1xf32>
    %140 = vector.shape_cast %139 : vector<1xf32> to vector<1x1x1xf32>
    %141 = vector.extract %140[0, 0, 0] : f32 from vector<1x1x1xf32>
    %cst_43 = arith.constant 0.000000e+00 : f32
    %142 = arith.subf %cst_43, %141 : f32
    %cst_44 = arith.constant 6.250000e-02 : f32
    %143 = arith.mulf %142, %cst_44 : f32
    %c0_45 = arith.constant 0 : index
    %144 = memref.load %arg6[%c0_45] : memref<1xf32, #tpu.memory_space<smem>>
    memref.store %143, %arg6[%c0_45] : memref<1xf32, #tpu.memory_space<smem>>
    return
  }
  func.func @transform_0(%arg0: i32) -> (i32, i32) {
    %c0_i32 = arith.constant 0 : i32
    %c0_i32_0 = arith.constant 0 : i32
    %c0_i32_1 = arith.constant 0 : i32
    return %c0_i32, %c0_i32_0 : i32, i32
  }
  func.func @transform_1(%arg0: i32) -> (i32, i32) {
    %c0_i32 = arith.constant 0 : i32
    %c0_i32_0 = arith.constant 0 : i32
    %c0_i32_1 = arith.constant 0 : i32
    return %c0_i32, %c0_i32_0 : i32, i32
  }
  func.func @transform_2(%arg0: i32) -> (i32, i32) {
    %c0_i32 = arith.constant 0 : i32
    %c0_i32_0 = arith.constant 0 : i32
    %c0_i32_1 = arith.constant 0 : i32
    return %c0_i32, %c0_i32_0 : i32, i32
  }
  func.func @transform_3(%arg0: i32) -> (i32, i32) {
    %c0_i32 = arith.constant 0 : i32
    %c0_i32_0 = arith.constant 0 : i32
    %c0_i32_1 = arith.constant 0 : i32
    return %c0_i32, %c0_i32_0 : i32, i32
  }
  func.func @transform_4(%arg0: i32) -> (i32, i32) {
    %c0_i32 = arith.constant 0 : i32
    %c0_i32_0 = arith.constant 0 : i32
    %c0_i32_1 = arith.constant 0 : i32
    return %c0_i32, %c0_i32_0 : i32, i32
  }
  func.func @transform_5(%arg0: i32) -> i32 {
    %c0_i32 = arith.constant 0 : i32
    %c0_i32_0 = arith.constant 0 : i32
    return %c0_i32 : i32
  }
}

</mosaic_0001>

<bundles_post_ra>
// kernel: model_forward.1
= control target key start
LH: loop header
LB: loop body
LE: loop exit
PB: predicated region body
PF: predicated region fallthrough
CT: control target
= control target key end

     0   :  { %s2253_s0 = inlined_call_operand.vmem [shape: f32[8,1024], index: 0, kind: input, shape index: {}]   ;;  %s2254_s1 = inlined_call_operand.vmem [shape: f32[8,1024], index: 1, kind: input, shape index: {}]   ;;  %s2255_s2 = inlined_call_operand.vmem [shape: f32[1024,32], index: 2, kind: input, shape index: {}]   ;;  %s2256_s3 = inlined_call_operand.vmem [shape: f32[16,32], index: 3, kind: input, shape index: {}]   ;;  %s2257_s4 = inlined_call_operand.vmem [shape: s32[8,2], index: 4, kind: input, shape index: {}]   ;;  %s2258_s5 = inlined_call_operand.hbm [shape: f32[1], index: 5, kind: output, shape index: {}]  }
   0x1   :  { %v56_v0 = vld [vmem:[%s2255_s2 + $0x80] sm:$0xff]  ;;  %v57_v1 = vld [vmem:[%s2255_s2 + $0x88] sm:$0xff]  ;;  %v58_v11 = vld [vmem:[%s2255_s2 + $0x90] sm:$0xff] }
   0x2   :  { %v88_v2 = vld [vmem:[%s2255_s2 + $0x180] sm:$0xff]  ;;  %v1453_v3 = vpack.c.bf16 %v57_v1, %v56_v0  ;;  %v89_v4 = vld [vmem:[%s2255_s2 + $0x188] sm:$0xff]  ;;  %v59_v13 = vld [vmem:[%s2255_s2 + $0x98] sm:$0xff] }
   0x3   :  { %v40_v5 = vld [vmem:[%s2255_s2] sm:$0xff]  ;;  %v41_v6 = vld [vmem:[%s2255_s2 + $0x8] sm:$0xff]  ;;  %v1464_v7 = vpack.c.bf16 %v89_v4, %v88_v2  ;;  %v90_v14 = vld [vmem:[%s2255_s2 + $0x190] sm:$0xff]  ;;  %v1491_v16 = vpack.c.bf16 %v59_v13, %v58_v11 }
   0x4   :  { %v1466_v8 = vpack.c.bf16 %v41_v6, %v40_v5  ;;  %v72_v9 = vld [vmem:[%s2255_s2 + $0x100] sm:$0xff]  ;;  %v73_v10 = vld [vmem:[%s2255_s2 + $0x108] sm:$0xff]  ;;  %1118 = vmatprep.subr.bf16.mxu0 %v1453_v3  ;;  %v91_v15 = vld [vmem:[%s2255_s2 + $0x198] sm:$0xff] }
   0x5   :  { %v1478_v12 = vpack.c.bf16 %v73_v10, %v72_v9  ;;  %1140 = vmatprep.subr.bf16.mxu1 %v1464_v7  ;;  %v1493_v17 = vpack.c.bf16 %v91_v15, %v90_v14  ;;  %v42_v18 = vld [vmem:[%s2255_s2 + $0x10] sm:$0xff]  ;;  %v43_v19 = vld [vmem:[%s2255_s2 + $0x18] sm:$0xff]  ;;  %v60_v23 = vld [vmem:[%s2255_s2 + $0xa0] sm:$0xff] }
   0x6   :  { %1119 = vmatpush3.bf16.msra.mxu0 %v1466_v8  ;;  %v74_v20 = vld [vmem:[%s2255_s2 + $0x110] sm:$0xff]  ;;  %v1505_v21 = vpack.c.bf16 %v43_v19, %v42_v18  ;;  %v75_v22 = vld [vmem:[%s2255_s2 + $0x118] sm:$0xff]  ;;  %v61_v24 = vld [vmem:[%s2255_s2 + $0xa8] sm:$0xff] }
   0x7   :  { %1141 = vmatpush3.bf16.msra.mxu1 %v1478_v12  ;;  %1120 = vmatprep.subr.bf16.mxu0 %v1491_v16  ;;  %v1518_v25 = vpack.c.bf16 %v75_v22, %v74_v20  ;;  %v1520_v26 = vpack.c.bf16 %v61_v24, %v60_v23  ;;  %v92_v27 = vld [vmem:[%s2255_s2 + $0x1a0] sm:$0xff]  ;;  %v93_v28 = vld [vmem:[%s2255_s2 + $0x1a8] sm:$0xff]  ;;  %v62_v35 = vld [vmem:[%s2255_s2 + $0xb0] sm:$0xff] }
   0x8   :  { %1142 = vmatprep.subr.bf16.mxu1 %v1493_v17  ;;  %v44_v29 = vld [vmem:[%s2255_s2 + $0x20] sm:$0xff]  ;;  %v1531_v30 = vpack.c.bf16 %v93_v28, %v92_v27  ;;  %v45_v31 = vld [vmem:[%s2255_s2 + $0x28] sm:$0xff]  ;;  %v63_v36 = vld [vmem:[%s2255_s2 + $0xb8] sm:$0xff] }
   0x9   :  { %v76_v32 = vld [vmem:[%s2255_s2 + $0x120] sm:$0xff]  ;;  %v77_v33 = vld [vmem:[%s2255_s2 + $0x128] sm:$0xff]  ;;  %v1543_v34 = vpack.c.bf16 %v45_v31, %v44_v29  ;;  %v94_v37 = vld [vmem:[%s2255_s2 + $0x1b0] sm:$0xff]  ;;  %v1558_v39 = vpack.c.bf16 %v63_v36, %v62_v35 }
   0xa   :  { %1121 = vmatpush3.bf16.msra.mxu0 %v1505_v21  ;;  %v1556_v38 = vpack.c.bf16 %v77_v33, %v76_v32  ;;  %v95_v40 = vld [vmem:[%s2255_s2 + $0x1b8] sm:$0xff]  ;;  %v46_v41 = vld [vmem:[%s2255_s2 + $0x30] sm:$0xff]  ;;  %v64_v46 = vld [vmem:[%s2255_s2 + $0xc0] sm:$0xff] }
   0xb   :  { %1143 = vmatpush3.bf16.msra.mxu1 %v1518_v25  ;;  %1122 = vmatprep.subr.bf16.mxu0 %v1520_v26  ;;  %v47_v42 = vld [vmem:[%s2255_s2 + $0x38] sm:$0xff]  ;;  %v1570_v43 = vpack.c.bf16 %v95_v40, %v94_v37  ;;  %v78_v44 = vld [vmem:[%s2255_s2 + $0x130] sm:$0xff]  ;;  %v65_v47 = vld [vmem:[%s2255_s2 + $0xc8] sm:$0xff] }
   0xc   :  { %1144 = vmatprep.subr.bf16.mxu1 %v1531_v30  ;;  %v79_v45 = vld [vmem:[%s2255_s2 + $0x138] sm:$0xff]  ;;  %v96_v48 = vld [vmem:[%s2255_s2 + $0x1c0] sm:$0xff]  ;;  %v97_v49 = vld [vmem:[%s2255_s2 + $0x1c8] sm:$0xff]  ;;  %v1591_v50 = vpack.c.bf16 %v47_v42, %v46_v41  ;;  %v1597_v52 = vpack.c.bf16 %v65_v47, %v64_v46 }
   0xd   :  { %v1595_v51 = vpack.c.bf16 %v79_v45, %v78_v44  ;;  %v48_v53 = vld [vmem:[%s2255_s2 + $0x40] sm:$0xff]  ;;  %v49_v54 = vld [vmem:[%s2255_s2 + $0x48] sm:$0xff]  ;;  %v1609_v56 = vpack.c.bf16 %v97_v49, %v96_v48  ;;  %v66_v58 = vld [vmem:[%s2255_s2 + $0xd0] sm:$0xff] }
   0xe   :  { %1123 = vmatpush3.bf16.msra.mxu0 %v1543_v34  ;;  %v80_v55 = vld [vmem:[%s2255_s2 + $0x140] sm:$0xff]  ;;  %v81_v57 = vld [vmem:[%s2255_s2 + $0x148] sm:$0xff]  ;;  %v67_v59 = vld [vmem:[%s2255_s2 + $0xd8] sm:$0xff]  ;;  %v1627_v62 = vpack.c.bf16 %v49_v54, %v48_v53 }
   0xf   :  { %1145 = vmatpush3.bf16.msra.mxu1 %v1556_v38  ;;  %1124 = vmatprep.subr.bf16.mxu0 %v1558_v39  ;;  %v98_v60 = vld [vmem:[%s2255_s2 + $0x1d0] sm:$0xff]  ;;  %v99_v61 = vld [vmem:[%s2255_s2 + $0x1d8] sm:$0xff]  ;;  %v1631_v63 = vpack.c.bf16 %v81_v57, %v80_v55  ;;  %v1633_v0 = vpack.c.bf16 %v67_v59, %v66_v58  ;;  %v68_v9 = vld [vmem:[%s2255_s2 + $0xe0] sm:$0xff] }
  0x10   :  { %1146 = vmatprep.subr.bf16.mxu1 %v1570_v43  ;;  %v50_v1 = vld [vmem:[%s2255_s2 + $0x50] sm:$0xff]  ;;  %v51_v2 = vld [vmem:[%s2255_s2 + $0x58] sm:$0xff]  ;;  %v1645_v5 = vpack.c.bf16 %v99_v61, %v98_v60  ;;  %v69_v10 = vld [vmem:[%s2255_s2 + $0xe8] sm:$0xff] }
  0x11   :  { %v82_v4 = vld [vmem:[%s2255_s2 + $0x150] sm:$0xff]  ;;  %v83_v6 = vld [vmem:[%s2255_s2 + $0x158] sm:$0xff]  ;;  %v100_v11 = vld [vmem:[%s2255_s2 + $0x1e0] sm:$0xff]  ;;  %v1663_v14 = vpack.c.bf16 %v51_v2, %v50_v1  ;;  %v1675_v20 = vpack.c.bf16 %v69_v10, %v68_v9 }
  0x12   :  { %1125 = vmatpush3.bf16.msra.mxu0 %v1591_v50  ;;  %v101_v13 = vld [vmem:[%s2255_s2 + $0x1e8] sm:$0xff]  ;;  %v52_v15 = vld [vmem:[%s2255_s2 + $0x60] sm:$0xff]  ;;  %v1673_v19 = vpack.c.bf16 %v83_v6, %v82_v4  ;;  %v235_v24 = vld [vmem:[%s2253_s0 + $0x18] sm:$0xff] }
  0x13   :  { %1147 = vmatpush3.bf16.msra.mxu1 %v1595_v51  ;;  %1126 = vmatprep.subr.bf16.mxu0 %v1597_v52  ;;  %v53_v18 = vld [vmem:[%s2255_s2 + $0x68] sm:$0xff]  ;;  %v84_v22 = vld [vmem:[%s2255_s2 + $0x160] sm:$0xff]  ;;  %v1687_v27 = vpack.c.bf16 %v101_v13, %v100_v11  ;;  %v70_v29 = vld [vmem:[%s2255_s2 + $0xf0] sm:$0xff]  ;;  %v243_v33 = vpack.c.bf16 %v235_v24, %v235_v24 }
  0x14   :  { %1148 = vmatprep.subr.bf16.mxu1 %v1609_v56  ;;  %v233_v23 = vld [vmem:[%s2253_s0 + $0x8] sm:$0xff]  ;;  %v71_v31 = vld [vmem:[%s2255_s2 + $0xf8] sm:$0xff]  ;;  %v102_v35 = vld [vmem:[%s2255_s2 + $0x1f0] sm:$0xff]  ;;  %v1705_v37 = vpack.c.bf16 %v53_v18, %v52_v15 }
  0x15   :  { %v85_v28 = vld [vmem:[%s2255_s2 + $0x168] sm:$0xff]  ;;  %v241_v32 = vpack.c.bf16 %v233_v23, %v233_v23  ;;  %v103_v36 = vld [vmem:[%s2255_s2 + $0x1f8] sm:$0xff]  ;;  %v1711_v41 = vpack.c.bf16 %v71_v31, %v70_v29  ;;  %v54_v42 = vld [vmem:[%s2255_s2 + $0x70] sm:$0xff]  ;;  %320 = vmatprep.mubr.bf16.mxu1 %v243_v33 }
  0x16   :  { %1127 = vmatpush3.bf16.msra.mxu0 %v1627_v62  ;;  %v1709_v40 = vpack.c.bf16 %v85_v28, %v84_v22  ;;  %v55_v44 = vld [vmem:[%s2255_s2 + $0x78] sm:$0xff]  ;;  %v86_v45 = vld [vmem:[%s2255_s2 + $0x170] sm:$0xff]  ;;  %v1723_v46 = vpack.c.bf16 %v103_v36, %v102_v35  ;;  %v120_v48 = vld [vmem:[%s2255_s2 + $0x280] sm:$0xff] }
  0x17   :  { %1149 = vmatpush3.bf16.msra.mxu1 %v1631_v63  ;;  %1128 = vmatprep.subr.bf16.mxu0 %v1633_v0  ;;  %v87_v47 = vld [vmem:[%s2255_s2 + $0x178] sm:$0xff]  ;;  %v121_v49 = vld [vmem:[%s2255_s2 + $0x288] sm:$0xff]  ;;  %v152_v53 = vld [vmem:[%s2255_s2 + $0x380] sm:$0xff]  ;;  %v1741_v55 = vpack.c.bf16 %v55_v44, %v54_v42 }
  0x18   :  { %1150 = vmatprep.subr.bf16.mxu1 %v1645_v5  ;;  %280 = vmatprep.mubr.bf16.mxu0 %v241_v32  ;;  %v153_v54 = vld [vmem:[%s2255_s2 + $0x388] sm:$0xff]  ;;  %v232_v57 = vld [vmem:[%s2253_s0] sm:$0xff]  ;;  %v234_v58 = vld [vmem:[%s2253_s0 + $0x10] sm:$0xff]  ;;  %v1751_v59 = vpack.c.bf16 %v87_v47, %v86_v45  ;;  %v1753_v60 = vpack.c.bf16 %v121_v49, %v120_v48 }
  0x19   :  { %v104_v61 = vld [vmem:[%s2255_s2 + $0x200] sm:$0xff]  ;;  %v105_v1 = vld [vmem:[%s2255_s2 + $0x208] sm:$0xff]  ;;  %v1765_v4 = vpack.c.bf16 %v153_v54, %v152_v53  ;;  %v122_v9 = vld [vmem:[%s2255_s2 + $0x290] sm:$0xff]  ;;  %v240_v11 = vpack.c.bf16 %v232_v57, %v232_v57  ;;  %v242_v18 = vpack.c.bf16 %v234_v58, %v234_v58 }
  0x1a   :  { %1129 = vmatpush3.bf16.msra.mxu0 %v1663_v14  ;;  %v136_v2 = vld [vmem:[%s2255_s2 + $0x300] sm:$0xff]  ;;  %v137_v6 = vld [vmem:[%s2255_s2 + $0x308] sm:$0xff]  ;;  %v123_v10 = vld [vmem:[%s2255_s2 + $0x298] sm:$0xff]  ;;  %v1783_v22 = vpack.c.bf16 %v105_v1, %v104_v61 }
  0x1b   :  { %1151 = vmatpush3.bf16.msra.mxu1 %v1673_v19  ;;  %1130 = vmatprep.subr.bf16.mxu0 %v1675_v20  ;;  %v154_v13 = vld [vmem:[%s2255_s2 + $0x390] sm:$0xff]  ;;  %v155_v15 = vld [vmem:[%s2255_s2 + $0x398] sm:$0xff]  ;;  %v1787_v23 = vpack.c.bf16 %v137_v6, %v136_v2  ;;  %v1789_v24 = vpack.c.bf16 %v123_v10, %v122_v9  ;;  %v124_v35 = vld [vmem:[%s2255_s2 + $0x2a0] sm:$0xff] }
  0x1c   :  { %1152 = vmatprep.subr.bf16.mxu1 %v1687_v27  ;;  %v106_v28 = vld [vmem:[%s2255_s2 + $0x210] sm:$0xff]  ;;  %v107_v29 = vld [vmem:[%s2255_s2 + $0x218] sm:$0xff]  ;;  %v1801_v32 = vpack.c.bf16 %v155_v15, %v154_v13  ;;  %v125_v36 = vld [vmem:[%s2255_s2 + $0x2a8] sm:$0xff] }
  0x1d   :  { %v138_v31 = vld [vmem:[%s2255_s2 + $0x310] sm:$0xff]  ;;  %v139_v33 = vld [vmem:[%s2255_s2 + $0x318] sm:$0xff]  ;;  %v156_v42 = vld [vmem:[%s2255_s2 + $0x3a0] sm:$0xff]  ;;  %v1819_v45 = vpack.c.bf16 %v107_v29, %v106_v28  ;;  %v1825_v48 = vpack.c.bf16 %v125_v36, %v124_v35 }
  0x1e   :  { %1131 = vmatpush3.bf16.msra.mxu0 %v1705_v37  ;;  %v157_v44 = vld [vmem:[%s2255_s2 + $0x3a8] sm:$0xff]  ;;  %v1823_v47 = vpack.c.bf16 %v139_v33, %v138_v31  ;;  %v108_v49 = vld [vmem:[%s2255_s2 + $0x220] sm:$0xff]  ;;  %v126_v61 = vld [vmem:[%s2255_s2 + $0x2b0] sm:$0xff] }
  0x1f   :  { %1153 = vmatpush3.bf16.msra.mxu1 %v1709_v40  ;;  %1132 = vmatprep.subr.bf16.mxu0 %v1711_v41  ;;  %v109_v53 = vld [vmem:[%s2255_s2 + $0x228] sm:$0xff]  ;;  %v140_v54 = vld [vmem:[%s2255_s2 + $0x320] sm:$0xff]  ;;  %v1837_v57 = vpack.c.bf16 %v157_v44, %v156_v42  ;;  %v127_v1 = vld [vmem:[%s2255_s2 + $0x2b8] sm:$0xff] }
  0x20   :  { %1154 = vmatprep.subr.bf16.mxu1 %v1723_v46  ;;  %v141_v58 = vld [vmem:[%s2255_s2 + $0x328] sm:$0xff]  ;;  %v158_v2 = vld [vmem:[%s2255_s2 + $0x3b0] sm:$0xff]  ;;  %v159_v6 = vld [vmem:[%s2255_s2 + $0x3b8] sm:$0xff]  ;;  %v1855_v9 = vpack.c.bf16 %v109_v53, %v108_v49  ;;  %v1864_v13 = vpack.c.bf16 %v127_v1, %v126_v61 }
  0x21   :  { %v110_v10 = vld [vmem:[%s2255_s2 + $0x230] sm:$0xff]  ;;  %v111_v15 = vld [vmem:[%s2255_s2 + $0x238] sm:$0xff]  ;;  %v1876_v29 = vpack.c.bf16 %v159_v6, %v158_v2  ;;  %v128_v31 = vld [vmem:[%s2255_s2 + $0x2c0] sm:$0xff] }
  0x22   :  { %1133 = vmatpush3.bf16.msra.mxu0 %v1741_v55  ;;  %v143_v28 = vld [vmem:[%s2255_s2 + $0x338] sm:$0xff]  ;;  %v129_v33 = vld [vmem:[%s2255_s2 + $0x2c8] sm:$0xff]  ;;  %v160_v35 = vld [vmem:[%s2255_s2 + $0x3c0] sm:$0xff]  ;;  %v1891_v42 = vpack.c.bf16 %v111_v15, %v110_v10 }
  0x23   :  { %1155 = vmatpush3.bf16.msra.mxu1 %v1751_v59  ;;  %1162 = vmatprep.subr.bf16.mxu0 %v1753_v60  ;;  %v161_v36 = vld [vmem:[%s2255_s2 + $0x3c8] sm:$0xff]  ;;  %v239_v53 = vld [vmem:[%s2253_s0 + $0x38] sm:$0xff]  ;;  %v144_v1 = vld [vmem:[%s2255_s2 + $0x340] sm:$0xff] }
  0x24   :  { %1184 = vmatprep.subr.bf16.mxu1 %v1765_v4  ;;  %v237_v49 = vld [vmem:[%s2253_s0 + $0x28] sm:$0xff]  ;;  %v247_v6 = vpack.c.bf16 %v239_v53, %v239_v53  ;;  %v1915_v10 = vpack.c.bf16 %v161_v36, %v160_v35 }
  0x25   :  { %281 = vmatmul.mubr.bf16.vlgmr.msra.gmra.mrb[0].mxu0 %v240_v11  ;;  %v1862_v11 = vpack.c.bf16 %v141_v58, %v140_v54  ;;  %v1903_v54 = vpack.c.bf16 %v129_v33, %v128_v31  ;;  %v112_v58 = vld [vmem:[%s2255_s2 + $0x240] sm:$0xff]  ;;  %v113_v61 = vld [vmem:[%s2255_s2 + $0x248] sm:$0xff]  ;;  %v245_v2 = vpack.c.bf16 %v237_v49, %v237_v49  ;;  %v162_v31 = vld [vmem:[%s2255_s2 + $0x3d0] sm:$0xff] }
  0x26   :  { %321 = vmatmul.mubr.bf16.vlgmr.msra.gmra.mrb[0].mxu1 %v242_v18  ;;  %1163 = vmatpush3.bf16.msra.mxu0 %v1783_v22  ;;  %v142_v18 = vld [vmem:[%s2255_s2 + $0x330] sm:$0xff]  ;;  %2269 = vst [vmem:[#allocation7_spill] sm:$0xff] %v1915_v10  ;;  %v145_v15 = vld [vmem:[%s2255_s2 + $0x348] sm:$0xff]  ;;  %v163_v33 = vld [vmem:[%s2255_s2 + $0x3d8] sm:$0xff]  ;;  %v1933_v35 = vpack.c.bf16 %v113_v61, %v112_v58 }
  0x27   :  { %1185 = vmatpush3.bf16.msra.mxu1 %v1787_v23  ;;  %1164 = vmatprep.subr.bf16.mxu0 %v1789_v24  ;;  %v1893_v44 = vpack.c.bf16 %v143_v28, %v142_v18  ;;  %2268 = vst [vmem:[#allocation6_spill] sm:$0xff] %v1903_v54  ;;  %v130_v18 = vld [vmem:[%s2255_s2 + $0x2d0] sm:$0xff]  ;;  %v131_v28 = vld [vmem:[%s2255_s2 + $0x2d8] sm:$0xff] }
  0x28   :  { %1186 = vmatprep.subr.bf16.mxu1 %v1801_v32  ;;  %360 = vmatprep.mubr.bf16.mxu0 %v245_v2  ;;  %2270 = vst [vmem:[#allocation8_spill] sm:$0xff] %v1933_v35 }
  0x29   :  { %2267 = vst [vmem:[#allocation5_spill] sm:$0xff] %v1893_v44  ;;  %400 = vmatprep.mubr.bf16.mxu1 %v247_v6 }
  0x2a   :  { %1165 = vmatpush3.bf16.msra.mxu0 %v1819_v45 }
  0x2b   :  { %1187 = vmatpush3.bf16.msra.mxu1 %v1823_v47  ;;  %1166 = vmatprep.subr.bf16.mxu0 %v1825_v48 }
  0x2c   :  { %1188 = vmatprep.subr.bf16.mxu1 %v1837_v57 }
  0x2e   :  { %1167 = vmatpush3.bf16.msra.mxu0 %v1855_v9 }
  0x2f   :  { %1189 = vmatpush3.bf16.msra.mxu1 %v1862_v11  ;;  %1168 = vmatprep.subr.bf16.mxu0 %v1864_v13 }
  0x30   :  { %1190 = vmatprep.subr.bf16.mxu1 %v1876_v29 }
  0x32   :  { %1169 = vmatpush3.bf16.msra.mxu0 %v1891_v42 }
  0x33   :  { %10 = vsyncpa [#allocation3], 0  ;;  %1191 = vmatpush3.bf16.msra.mxu1 %v1893_v44  ;;  %1170 = vmatprep.subr.bf16.mxu0 %v1903_v54  ;;  %v1937_v36 = vpack.c.bf16 %v145_v15, %v144_v1  ;;  %v1939_v49 = vpack.c.bf16 %v131_v28, %v130_v18  ;;  %v114_v53 = vld [vmem:[%s2255_s2 + $0x250] sm:$0xff]  ;;  %v115_v2 = vld [vmem:[%s2255_s2 + $0x258] sm:$0xff]  ;;  %v1951_v61 = vpack.c.bf16 %v163_v33, %v162_v31  ;;  %vm588_vm0 = vcmask 261120   ;;  %s1406_s6 = smov 32  }
  0x34   :  { %v146_v58 = vld [vmem:[%s2255_s2 + $0x350] sm:$0xff]  ;;  %1192 = vmatprep.subr.bf16.mxu1 %v1915_v10  ;;  %v147_v1 = vld [vmem:[%s2255_s2 + $0x358] sm:$0xff]  ;;  %v132_v6 = vld [vmem:[%s2255_s2 + $0x2e0] sm:$0xff]  ;;  %v1969_v31 = vpack.c.bf16 %v115_v2, %v114_v53  ;;  %vm590_vm1 = vcmask 64512   ;;  %vm1408_vm2 = vmmov 0   ;;  %s1411_s7 = smov 8  }
  0x35   :  { %2271 = vst [vmem:[#allocation9_spill] sm:$0xff] %v1937_v36  ;;  %2272 = vst [vmem:[#allocation10_spill] sm:$0xff] %v1939_v49  ;;  %v133_v15 = vld [vmem:[%s2255_s2 + $0x2e8] sm:$0xff]  ;;  %v164_v18 = vld [vmem:[%s2255_s2 + $0x3e0] sm:$0xff]  ;;  %v1973_v33 = vpack.c.bf16 %v147_v1, %v146_v58  ;;  %s1412_s8 = smov 120   ;;  %s1393_s14 = scalar_lea.hbm %s2258_s5, 16 }
  0x36   :  { %2273 = vst [vmem:[#allocation11_spill] sm:$0xff] %v1951_v61  ;;  %v165_v28 = vld [vmem:[%s2255_s2 + $0x3e8] sm:$0xff]  ;;  %1171 = vmatpush3.bf16.msra.mxu0 %v1933_v35  ;;  %v1975_v10 = vpack.c.bf16 %v133_v15, %v132_v6  ;;  %v116_v54 = vld [vmem:[%s2255_s2 + $0x260] sm:$0xff]  ;;  %v134_v1 = vld [vmem:[%s2255_s2 + $0x2f0] sm:$0xff]  ;;  %p1394_p0 = scmp.ne.s32.totalorder %s2258_s5, %s1393_s14  ;;  %p1397_p1 = scmp.lt.u32.totalorder %s1393_s14, %s2258_s5 }
  0x37   :  { %1193 = vmatpush3.bf16.msra.mxu1 %v1937_v36  ;;  %1172 = vmatprep.subr.bf16.mxu0 %v1939_v49  ;;  %v117_v44 = vld [vmem:[%s2255_s2 + $0x268] sm:$0xff]  ;;  %v148_v53 = vld [vmem:[%s2255_s2 + $0x360] sm:$0xff]  ;;  %v1987_v2 = vpack.c.bf16 %v165_v28, %v164_v18  ;;  %v135_v6 = vld [vmem:[%s2255_s2 + $0x2f8] sm:$0xff] }
  0x38   :  { %1194 = vmatprep.subr.bf16.mxu1 %v1951_v61  ;;  %v149_v58 = vld [vmem:[%s2255_s2 + $0x368] sm:$0xff]  ;;  %v166_v15 = vld [vmem:[%s2255_s2 + $0x3f0] sm:$0xff]  ;;  %v167_v18 = vld [vmem:[%s2255_s2 + $0x3f8] sm:$0xff]  ;;  %v2005_v28 = vpack.c.bf16 %v117_v44, %v116_v54  ;;  %v2011_v49 = vpack.c.bf16 %v135_v6, %v134_v1  ;;  %p1399_p2 = pnand %p1397_p1, %p1394_p0 }
  0x39   :  { %v2009_v61 = vpack.c.bf16 %v149_v58, %v148_v53  ;;  %v118_v36 = vld [vmem:[%s2255_s2 + $0x270] sm:$0xff]  ;;  %v119_v35 = vld [vmem:[%s2255_s2 + $0x278] sm:$0xff]  ;;  %v2020_v44 = vpack.c.bf16 %v167_v18, %v166_v15  ;;  %v236_v1 = vld [vmem:[%s2253_s0 + $0x20] sm:$0xff] }
  0x3a   :  { %1173 = vmatpush3.bf16.msra.mxu0 %v1969_v31  ;;  %2274 = vst [vmem:[#allocation12_spill] sm:$0xff] %v2011_v49  ;;  %v150_v54 = vld [vmem:[%s2255_s2 + $0x370] sm:$0xff]  ;;  %v151_v53 = vld [vmem:[%s2255_s2 + $0x378] sm:$0xff]  ;;  %v2029_v58 = vpack.c.bf16 %v119_v35, %v118_v36  ;;  %v244_v18 = vpack.c.bf16 %v236_v1, %v236_v1  ;;  %v409_v35 = vld [vmem:[%s2254_s1 + $0x8] sm:$0xff] }
  0x3b   :  { %1195 = vmatpush3.bf16.msra.mxu1 %v1973_v33  ;;  %1174 = vmatprep.subr.bf16.mxu0 %v1975_v10  ;;  %v2036_v6 = vpack.c.bf16 %v151_v53, %v150_v54  ;;  %v238_v15 = vld [vmem:[%s2253_s0 + $0x30] sm:$0xff]  ;;  %v417_v54 = vpack.c.bf16 %v409_v35, %v409_v35 }
  0x3c   :  { %1196 = vmatprep.subr.bf16.mxu1 %v1987_v2  ;;  %v246_v36 = vpack.c.bf16 %v238_v15, %v238_v15 }
  0x3e   :  { %1175 = vmatpush3.bf16.msra.mxu0 %v2005_v28 }
  0x3f   :  { %1197 = vmatpush3.bf16.msra.mxu1 %v2009_v61  ;;  %1176 = vmatprep.subr.bf16.mxu0 %v2011_v49  ;;  %v411_v49 = vld [vmem:[%s2254_s1 + $0x18] sm:$0xff] }
  0x40   :  { %1198 = vmatprep.subr.bf16.mxu1 %v2020_v44  ;;  %v419_v53 = vpack.c.bf16 %v411_v49, %v411_v49 }
  0x42   :  { %1177 = vmatpush3.bf16.msra.mxu0 %v2029_v58 }
  0x43   :  { %1199 = vmatpush3.bf16.msra.mxu1 %v2036_v6  ;;  %1206 = vmatprep.subr.bf16.mxu0 %v1453_v3  ;;  %v408_v3 = vld [vmem:[%s2254_s1] sm:$0xff] }
  0x44   :  { %1228 = vmatprep.subr.bf16.mxu1 %v1464_v7  ;;  %v410_v7 = vld [vmem:[%s2254_s1 + $0x10] sm:$0xff] }
  0x45   :  { %361 = vmatmul.mubr.bf16.vlgmr.msra.gmra.mrb[4].mxu0 %v244_v18 }
  0x46   :  { %401 = vmatmul.mubr.bf16.vlgmr.msra.gmra.mrb[4].mxu1 %v246_v36  ;;  %1207 = vmatpush3.bf16.msra.mxu0 %v1466_v8  ;;  %v416_v8 = vpack.c.bf16 %v408_v3, %v408_v3 }
  0x47   :  { %1229 = vmatpush3.bf16.msra.mxu1 %v1478_v12  ;;  %1208 = vmatprep.subr.bf16.mxu0 %v1491_v16  ;;  %v413_v12 = vld [vmem:[%s2254_s1 + $0x28] sm:$0xff]  ;;  %v418_v16 = vpack.c.bf16 %v410_v7, %v410_v7 }
  0x48   :  { %1230 = vmatprep.subr.bf16.mxu1 %v1493_v17  ;;  %456 = vmatprep.mubr.bf16.mxu0 %v417_v54  ;;  %v415_v17 = vld [vmem:[%s2254_s1 + $0x38] sm:$0xff] }
  0x49   :  { %496 = vmatprep.mubr.bf16.mxu1 %v419_v53 }
  0x4a   :  { %1209 = vmatpush3.bf16.msra.mxu0 %v1505_v21  ;;  %v421_v21 = vpack.c.bf16 %v413_v12, %v413_v12 }
  0x4b   :  { %1231 = vmatpush3.bf16.msra.mxu1 %v1518_v25  ;;  %1210 = vmatprep.subr.bf16.mxu0 %v1520_v26  ;;  %v423_v25 = vpack.c.bf16 %v415_v17, %v415_v17  ;;  %v2275_v26 = vld [vmem:[#allocation5_spill] sm:$0xff] }
  0x4c   :  { %1232 = vmatprep.subr.bf16.mxu1 %v1531_v30  ;;  %v2276_v30 = vld [vmem:[#allocation6_spill] sm:$0xff] }
  0x4e   :  { %1211 = vmatpush3.bf16.msra.mxu0 %v1543_v34  ;;  %v2277_v34 = vld [vmem:[#allocation7_spill] sm:$0xff] }
  0x4f   :  { %1233 = vmatpush3.bf16.msra.mxu1 %v1556_v38  ;;  %1212 = vmatprep.subr.bf16.mxu0 %v1558_v39  ;;  %v2278_v38 = vld [vmem:[#allocation8_spill] sm:$0xff]  ;;  %v2279_v39 = vld [vmem:[#allocation9_spill] sm:$0xff] }
  0x50   :  { %1234 = vmatprep.subr.bf16.mxu1 %v1570_v43  ;;  %v2280_v43 = vld [vmem:[#allocation10_spill] sm:$0xff] }
  0x52   :  { %1213 = vmatpush3.bf16.msra.mxu0 %v1591_v50  ;;  %v2281_v50 = vld [vmem:[#allocation11_spill] sm:$0xff] }
  0x53   :  { %1235 = vmatpush3.bf16.msra.mxu1 %v1595_v51  ;;  %1214 = vmatprep.subr.bf16.mxu0 %v1597_v52  ;;  %v412_v51 = vld [vmem:[%s2254_s1 + $0x20] sm:$0xff]  ;;  %v2282_v52 = vld [vmem:[#allocation12_spill] sm:$0xff] }
  0x54   :  { %1236 = vmatprep.subr.bf16.mxu1 %v1609_v56  ;;  %v414_v56 = vld [vmem:[%s2254_s1 + $0x30] sm:$0xff] }
  0x56   :  { %1215 = vmatpush3.bf16.msra.mxu0 %v1627_v62  ;;  %v420_v62 = vpack.c.bf16 %v412_v51, %v412_v51 }
  0x57   :  { %1237 = vmatpush3.bf16.msra.mxu1 %v1631_v63  ;;  %1216 = vmatprep.subr.bf16.mxu0 %v1633_v0  ;;  %v422_v63 = vpack.c.bf16 %v414_v56, %v414_v56  ;;  %v700_v0 = vld [vmem:[%s2256_s3] sm:$0xff] }
  0x58   :  { %1238 = vmatprep.subr.bf16.mxu1 %v1645_v5  ;;  %v701_v5 = vmul.f32 %v700_v0, %v700_v0 }
  0x5a   :  { %1217 = vmatpush3.bf16.msra.mxu0 %v1663_v14  ;;  %v702_v14 = vsel %vm588_vm0, %v701_v5, 0.0 }
  0x5b   :  { %1239 = vmatpush3.bf16.msra.mxu1 %v1673_v19  ;;  %1218 = vmatprep.subr.bf16.mxu0 %v1675_v20 }
  0x5c   :  { %1240 = vmatprep.subr.bf16.mxu1 %v1687_v27  ;;  %703 = vadd.xlane.f32.xlu0 %v702_v14  ;;  %v1405_v14 = vmov 1  }
  0x5d   :  { %1332 = vset.pattern.permute.xlu0 %v1405_v14 }
  0x5e   :  { %1219 = vmatpush3.bf16.msra.mxu0 %v1705_v37 }
  0x5f   :  { %1241 = vmatpush3.bf16.msra.mxu1 %v1709_v40  ;;  %1220 = vmatprep.subr.bf16.mxu0 %v1711_v41 }
  0x60   :  { %1242 = vmatprep.subr.bf16.mxu1 %v1723_v46 }
  0x62   :  { %1221 = vmatpush3.bf16.msra.mxu0 %v1741_v55 }
  0x63   :  { %1243 = vmatpush3.bf16.msra.mxu1 %v1751_v59  ;;  %1250 = vmatprep.subr.bf16.mxu0 %v1753_v60 }
  0x64   :  { %1272 = vmatprep.subr.bf16.mxu1 %v1765_v4 }
  0x65   :  { %457 = vmatmul.mubr.bf16.vlgmr.msra.gmra.mrb[8].mxu0 %v416_v8 }
  0x66   :  { %497 = vmatmul.mubr.bf16.vlgmr.msra.gmra.mrb[8].mxu1 %v418_v16  ;;  %1251 = vmatpush3.bf16.msra.mxu0 %v1783_v22 }
  0x67   :  { %1273 = vmatpush3.bf16.msra.mxu1 %v1787_v23  ;;  %1252 = vmatprep.subr.bf16.mxu0 %v1789_v24 }
  0x68   :  { %1274 = vmatprep.subr.bf16.mxu1 %v1801_v32  ;;  %536 = vmatprep.mubr.bf16.mxu0 %v421_v21 }
  0x69   :  { %576 = vmatprep.mubr.bf16.mxu1 %v423_v25 }
  0x6a   :  { %1253 = vmatpush3.bf16.msra.mxu0 %v1819_v45 }
  0x6b   :  { %1275 = vmatpush3.bf16.msra.mxu1 %v1823_v47  ;;  %1254 = vmatprep.subr.bf16.mxu0 %v1825_v48 }
  0x6c   :  { %1276 = vmatprep.subr.bf16.mxu1 %v1837_v57 }
  0x6e   :  { %1255 = vmatpush3.bf16.msra.mxu0 %v1855_v9 }
  0x6f   :  { %1277 = vmatpush3.bf16.msra.mxu1 %v1862_v11  ;;  %1256 = vmatprep.subr.bf16.mxu0 %v1864_v13 }
  0x70   :  { %1278 = vmatprep.subr.bf16.mxu1 %v1876_v29 }
  0x72   :  { %1257 = vmatpush3.bf16.msra.mxu0 %v1891_v42 }
  0x73   :  { %1279 = vmatpush3.bf16.msra.mxu1 %v2275_v26  ;;  %1258 = vmatprep.subr.bf16.mxu0 %v2276_v30 }
  0x74   :  { %1280 = vmatprep.subr.bf16.mxu1 %v2277_v34 }
  0x76   :  { %1259 = vmatpush3.bf16.msra.mxu0 %v2278_v38 }
  0x77   :  { %1281 = vmatpush3.bf16.msra.mxu1 %v2279_v39  ;;  %1260 = vmatprep.subr.bf16.mxu0 %v2280_v43 }
  0x78   :  { %1282 = vmatprep.subr.bf16.mxu1 %v2281_v50 }
  0x7a   :  { %1261 = vmatpush3.bf16.msra.mxu0 %v1969_v31 }
  0x7b   :  { %1283 = vmatpush3.bf16.msra.mxu1 %v1973_v33  ;;  %1262 = vmatprep.subr.bf16.mxu0 %v1975_v10 }
  0x7c   :  { %1284 = vmatprep.subr.bf16.mxu1 %v1987_v2 }
  0x7e   :  { %1263 = vmatpush3.bf16.msra.mxu0 %v2005_v28 }
  0x7f   :  { %1285 = vmatpush3.bf16.msra.mxu1 %v2009_v61  ;;  %1264 = vmatprep.subr.bf16.mxu0 %v2282_v52 }
  0x80   :  { %1286 = vmatprep.subr.bf16.mxu1 %v2020_v44 }
  0x82   :  { %1265 = vmatpush3.bf16.msra.mxu0 %v2029_v58 }
  0x83   :  { %1287 = vmatpush3.bf16.msra.mxu1 %v2036_v6 }
  0x85   :  { %537 = vmatmul.mubr.bf16.vlgmr.msra.gmra.mrb[12].mxu0 %v420_v62 }
  0x86   :  { %577 = vmatmul.mubr.bf16.vlgmr.msra.gmra.mrb[12].mxu1 %v422_v63 }
  0xe9   :  { %v704_v26 = vpop.xlane.xlu0 %703 }
  0xea   :  { %v705_v34 = vmax.f32 %v704_v26, 1e-24 }
  0xec   :  { %1335 = vrsqrt.f32 %v705_v34 }
  0xf6   :  { %v1336_v38 = vpop.eup %1335 }
  0xf7   :  { %v707_v39 = vmul.f32 %v1336_v38, %v700_v0  ;;  %v2155_v0 = vld [vmem:[%s2257_s4] sm:$0xff]  ;;  %s1409_s4 = smov 96  }
  0xf8   :  { %v1134_v19 = vpop.f32.mrb[0].mxu0  ;;  %vm39_vm4 = vcmp.ge.s32.totalorder %v2155_v0, 0  ;;  %vm31_vm5 = vcmp.gt.s32.totalorder %v2155_v0, 0 }
  0xf9   :  { %v1156_v20 = vpop.f32.mrb[0].mxu1  ;;  %v1135_v27 = vpop.f32.mrb[1].mxu0  ;;  %1308 = vmatprep.subr.msk.mxu1 %vm588_vm0, %v707_v39 }
  0xfa   :  { %v1136_v37 = vadd.f32 %v1135_v27, %v1134_v19  ;;  %v1157_v40 = vpop.f32.mrb[1].mxu1  ;;  %v1137_v41 = vpop.f32.mrb[2].mxu0  ;;  %1309 = vmatpush3.xpose.msk.msra.mxu1 %vm588_vm0, %v707_v39 }
  0xfb   :  { %v1158_v46 = vadd.f32 %v1157_v40, %v1156_v20  ;;  %v1159_v55 = vpop.f32.mrb[2].mxu1  ;;  %v1138_v59 = vpop.f32.mrb[3].mxu0  ;;  %v1407_v40 = vmov 0.0  }
  0xfc   :  { %v1160_v60 = vpop.f32.mrb[3].mxu1  ;;  %1303 = vmatprep.subr.mxu0 %v1407_v40  ;;  %1305 = vmatprep.mubr.msk.f32.mxu0 %vm1408_vm2, %v1407_v40  ;;  %v23_v55 = vlaneseq }
  0xfd   :  { %v323_v4 = vadd.f32 %v1158_v46, %v1136_v37 }
  0xfe   :  { %v2170_v59 = vand.u32 127, %v23_v55 }
 0x118   :  { %v1178_v22 = vpop.f32.mrb[4].mxu0 }
 0x119   :  { %v1200_v23 = vpop.f32.mrb[4].mxu1  ;;  %v1179_v24 = vpop.f32.mrb[5].mxu0 }
 0x11a   :  { %v1180_v32 = vadd.f32 %v1179_v24, %v1178_v22  ;;  %v1201_v45 = vpop.f32.mrb[5].mxu1  ;;  %v1181_v47 = vpop.f32.mrb[6].mxu0 }
 0x11b   :  { %v1202_v48 = vadd.f32 %v1201_v45, %v1200_v23  ;;  %v1203_v57 = vpop.f32.mrb[6].mxu1  ;;  %v1182_v9 = vpop.f32.mrb[7].mxu0 }
 0x11c   :  { %v363_v11 = vadd.f32 %v1180_v32, %v323_v4  ;;  %v1204_v13 = vpop.f32.mrb[7].mxu1 }
 0x11e   :  { %v2136_v29 = vadd.f32 %v1202_v48, %v363_v11 }
 0x120   :  { %v672_v42 = vmul.f32 %v2136_v29, %v2136_v29 }
 0x122   :  { %v676_v10 = vsel %vm588_vm0, %v672_v42, 0.0 }
 0x123   :  { %677 = vadd.xlane.f32.xlu0 %v676_v10 }
 0x138   :  { %v1222_v49 = vpop.f32.mrb[8].mxu0 }
 0x139   :  { %v1244_v61 = vpop.f32.mrb[8].mxu1  ;;  %v1223_v31 = vpop.f32.mrb[9].mxu0  ;;  %26 = vperm.xlu0 %1332, %v2155_v0  }
 0x13a   :  { %v1224_v33 = vadd.f32 %v1223_v31, %v1222_v49  ;;  %v1245_v2 = vpop.f32.mrb[9].mxu1  ;;  %v1225_v28 = vpop.f32.mrb[10].mxu0 }
 0x13b   :  { %v1246_v44 = vadd.f32 %v1245_v2, %v1244_v61  ;;  %v1247_v58 = vpop.f32.mrb[10].mxu1  ;;  %v1226_v1 = vpop.f32.mrb[11].mxu0 }
 0x13c   :  { %v1248_v6 = vpop.f32.mrb[11].mxu1 }
 0x13d   :  { %v499_v15 = vadd.f32 %v1246_v44, %v1224_v33 }
 0x158   :  { %v1266_v18 = vpop.f32.mrb[12].mxu0 }
 0x159   :  { %v1288_v35 = vpop.f32.mrb[12].mxu1  ;;  %v1267_v36 = vpop.f32.mrb[13].mxu0 }
 0x15a   :  { %v1268_v54 = vadd.f32 %v1267_v36, %v1266_v18  ;;  %v1289_v53 = vpop.f32.mrb[13].mxu1  ;;  %v1269_v3 = vpop.f32.mrb[14].mxu0 }
 0x15b   :  { %v1290_v7 = vadd.f32 %v1289_v53, %v1288_v35  ;;  %v1291_v8 = vpop.f32.mrb[14].mxu1  ;;  %v1270_v12 = vpop.f32.mrb[15].mxu0 }
 0x15c   :  { %v539_v16 = vadd.f32 %v1268_v54, %v499_v15  ;;  %v1292_v17 = vpop.f32.mrb[15].mxu1 }
 0x15e   :  { %v2141_v21 = vadd.f32 %v1290_v7, %v539_v16 }
 0x160   :  { %v673_v25 = vmul.f32 %v2141_v21, %v2141_v21 }
 0x162   :  { %v679_v30 = vsel %vm588_vm0, %v673_v25, 0.0 }
 0x163   :  { %680 = vadd.xlane.f32.xlu1 %v679_v30 }
 0x1b0   :  { %v678_v43 = vpop.xlane.xlu0 %677 }
 0x1b1   :  { %v688_v50 = vmax.f32 %v678_v43, 1e-24 }
 0x1b3   :  { %1337 = vrsqrt.f32 %v688_v50 }
 0x1b8   :  { %v27_v60 = vpop.permute.xlu0 %26 }
 0x1b9   :  { %vm28_vm3 = vcmp.eq.s32.totalorder %v2170_v59, %v27_v60 }
 0x1ba   :  { %v2174_v32 = vsel %vm28_vm3, 1.0, %v1407_v40 }
 0x1bd   :  { %v1338_v51 = vpop.eup %1337 }
 0x1be   :  { %v696_v52 = vmul.f32 %v1338_v51, %v2136_v29 }
 0x1c0   :  { %1310 = vmatprep.mubr.msk.f32.mxu1 %vm588_vm0, %v696_v52 }
 0x1f0   :  { %v681_v56 = vpop.xlane.xlu1 %680 }
 0x1f1   :  { %v689_v62 = vmax.f32 %v681_v56, 1e-24 }
 0x1f3   :  { %1339 = vrsqrt.f32 %v689_v62 }
 0x1fd   :  { %v1340_v63 = vpop.eup %1339 }
 0x1fe   :  { %v697_v5 = vmul.f32 %v1340_v63, %v2141_v21 }
 0x200   :  { %1311 = vmatmul.mubr.msk.f32.vlgmr.msra.gmra.mrb[16].mxu1 %vm588_vm0, %v697_v5 }
 0x2d3   :  { %v2158_v19 = vpop.f32.mrb[16].mxu1 }
 0x2d4   :  { %v861_v20 = vmul.f32 20.0, %v2158_v19  ;;  %v2161_v27 = vpop.f32.mrb[17].mxu1 }
 0x2d5   :  { %v860_v41 = vmul.f32 20.0, %v2161_v27 }
 0x2d6   :  { %v865_v37 = vsel %vm590_vm1, %v861_v20, -inf }
 0x2d7   :  { %866 = vmax.xlane.f32.xlu1 %v865_v37  ;;  %v862_v46 = vsel %vm590_vm1, %v860_v41, -inf }
 0x2e8   :  { %585 = vrot.lane.b32.xlu1 %v2141_v21, %s1406_s6 }
 0x30c   :  { %863 = vmax.xlane.f32.xlu1 %v862_v46 }
 0x364   :  { %v867_v4 = vpop.xlane.xlu1 %866 }
 0x365   :  { %v869_v22 = vsub.f32 %v861_v20, %v867_v4 }
 0x367   :  { %v872_v23 = vmul.f32 1.442695, %v869_v22 }
 0x368   :  { %v586_v24 = vpop.permute.xlu1 %585 }
 0x369   :  { %1341 = vpow2.f32 %v872_v23  ;;  %v589_v45 = vsel %vm588_vm0, %v2136_v29, %v586_v24 }
 0x36a   :  { %1304 = vmatpush3.msra.mxu0 %v589_v45 }
 0x36b   :  { %1306 = vmatmul.mubr.msk.f32.vlgmr.msra.gmra.mrb[16].mxu0 %vm590_vm1, %v2174_v32  ;;  %1316 = vmatprep.subr.mxu0 %v1407_v40 }
 0x36c   :  { %1318 = vmatprep.mubr.msk.f32.mxu0 %vm1408_vm2, %v1407_v40 }
 0x373   :  { %v1342_v47 = vpop.eup %1341 }
 0x374   :  { %v877_v48 = vsel %vm590_vm1, %v1342_v47, 0.0 }
 0x375   :  { %878 = vadd.xlane.f32.xlu0 %v877_v48 }
 0x399   :  { %v864_v57 = vpop.xlane.xlu1 %863 }
 0x39a   :  { %v868_v9 = vsub.f32 %v860_v41, %v864_v57 }
 0x39c   :  { %v870_v11 = vmul.f32 1.442695, %v868_v9 }
 0x39e   :  { %1343 = vpow2.f32 %v870_v11 }
 0x3a8   :  { %v1344_v13 = vpop.eup %1343 }
 0x3a9   :  { %v874_v42 = vsel %vm590_vm1, %v1344_v13, 0.0 }
 0x3aa   :  { %875 = vadd.xlane.f32.xlu1 %v874_v42 }
 0x402   :  { %v879_v10 = vpop.xlane.xlu0 %878 }
 0x403   :  { %v881_v49 = vmax.f32 %v879_v10, 1e-12 }
 0x405   :  { %1345 = vrcp.f32 %v881_v49 }
 0x40f   :  { %v1346_v61 = vpop.eup %1345 }
 0x410   :  { %v885_v31 = vmul.f32 %v1346_v61, %v1342_v47 }
 0x412   :  { %v893_v33 = vsel %vm590_vm1, %v885_v31, 0.0 }
 0x413   :  { %v894_v2 = vrot.slane %v893_v33, 4 }
 0x415   :  { %v895_v28 = vadd.f32 %v894_v2, %v893_v33 }
 0x417   :  { %v896_v44 = vrot.slane %v895_v28, 2 }
 0x419   :  { %v897_v58 = vadd.f32 %v896_v44, %v895_v28 }
 0x41b   :  { %v898_v1 = vrot.slane %v897_v58, 1 }
 0x41d   :  { %v899_v6 = vadd.f32 %v898_v1, %v897_v58 }
 0x41f   :  { %v901_v15 = vmax.f32 %v899_v6, 1e-12 }
 0x421   :  { %1347 = vrcp.f32 %v901_v15 }
 0x42b   :  { %v1348_v18 = vpop.eup %1347 }
 0x42c   :  { %v905_v35 = vmul.f32 %v1348_v18, %v885_v31 }
 0x42e   :  { %v909_v36 = vsel %vm590_vm1, %v905_v35, 0.0 }
 0x42f   :  { %910 = vadd.xlane.f32.xlu1 %v909_v36 }
 0x437   :  { %v876_v54 = vpop.xlane.xlu1 %875 }
 0x438   :  { %v880_v53 = vmax.f32 %v876_v54, 1e-12 }
 0x43a   :  { %1349 = vrcp.f32 %v880_v53 }
 0x43e   :  { %v660_v3 = vpop.f32.mrb[16].mxu0 }
 0x43f   :  { %v1307_v7 = vpop.f32.mrb[17].mxu0  ;;  %v670_v52 = vadd.f32 %v660_v3, %v2141_v21 }
 0x441   :  { %v2190_v56 = vmul.f32 0.5, %v670_v52 }
 0x443   :  { %v675_v62 = vmul.f32 %v2190_v56, %v2190_v56 }
 0x444   :  { %v1350_v8 = vpop.eup %1349 }
 0x445   :  { %v883_v12 = vmul.f32 %v1350_v8, %v1344_v13  ;;  %v685_v63 = vsel %vm588_vm0, %v675_v62, 0.0 }
 0x447   :  { %v886_v16 = vsel %vm590_vm1, %v883_v12, 0.0 }
 0x448   :  { %v887_v17 = vrot.slane %v886_v16, 4 }
 0x44a   :  { %v888_v25 = vadd.f32 %v887_v17, %v886_v16 }
 0x44c   :  { %v889_v26 = vrot.slane %v888_v25, 2 }
 0x44e   :  { %v890_v30 = vadd.f32 %v889_v26, %v888_v25 }
 0x450   :  { %v891_v34 = vrot.slane %v890_v30, 1 }
 0x452   :  { %v892_v38 = vadd.f32 %v891_v34, %v890_v30 }
 0x454   :  { %v900_v39 = vmax.f32 %v892_v38, 1e-12 }
 0x456   :  { %1351 = vrcp.f32 %v900_v39 }
 0x460   :  { %v1352_v43 = vpop.eup %1351 }
 0x461   :  { %v903_v50 = vmul.f32 %v1352_v43, %v883_v12 }
 0x463   :  { %v906_v51 = vsel %vm590_vm1, %v903_v50, 0.0 }
 0x464   :  { %907 = vadd.xlane.f32.xlu1 %v906_v51 }
 0x475   :  { %665 = vrot.lane.b32.xlu1 %v660_v3, %s1409_s4 }
 0x499   :  { %686 = vadd.xlane.f32.xlu1 %v685_v63 }
 0x4bc   :  { %v911_v5 = vpop.xlane.xlu1 %910 }
 0x4bd   :  { %v913_v14 = vmax.f32 %v911_v5, 1e-12 }
 0x4bf   :  { %1353 = vrcp.f32 %v913_v14 }
 0x4c9   :  { %v1354_v20 = vpop.eup %1353 }
 0x4ca   :  { %v917_v37 = vmul.f32 %v1354_v20, %v905_v35  ;;  %v1410_v35 = vmov 0  }
 0x4cb   :  { %1333 = vset.pattern.permute.xlu0 %v1410_v35  ;;  %1334 = vset.pattern.permute.xlu1 %v1410_v35  ;;  %v982_v36 = vsel %vm39_vm4, 1, %v1410_v35 }
 0x4cc   :  { %v925_v41 = vsel %vm590_vm1, %v917_v37, 0.0  ;;  %984 = vperm.xlu1 %1334, %v982_v36  }
 0x4cd   :  { %v926_v46 = vrot.slane %v925_v41, 4 }
 0x4cf   :  { %v927_v55 = vadd.f32 %v926_v46, %v925_v41  ;;  %v32_v46 = vsel %vm31_vm5, %v2155_v0, 0 }
 0x4d1   :  { %v928_v60 = vrot.slane %v927_v55, 2 }
 0x4d3   :  { %v929_v4 = vadd.f32 %v928_v60, %v927_v55 }
 0x4d5   :  { %v930_v21 = vrot.slane %v929_v4, 1 }
 0x4d7   :  { %v931_v22 = vadd.f32 %v930_v21, %v929_v4 }
 0x4d9   :  { %v933_v23 = vmax.f32 %v931_v22, 1e-12 }
 0x4db   :  { %1355 = vrcp.f32 %v933_v23 }
 0x4e5   :  { %v1356_v24 = vpop.eup %1355 }
 0x4e6   :  { %v937_v45 = vmul.f32 %v1356_v24, %v917_v37 }
 0x4e8   :  { %v941_v47 = vsel %vm590_vm1, %v937_v45, 0.0 }
 0x4e9   :  { %942 = vadd.xlane.f32.xlu0 %v941_v47 }
 0x4f1   :  { %v908_v48 = vpop.xlane.xlu1 %907 }
 0x4f2   :  { %v912_v57 = vmax.f32 %v908_v48, 1e-12 }
 0x4f4   :  { %1357 = vrcp.f32 %v912_v57 }
 0x4f5   :  { %v666_v9 = vpop.permute.xlu1 %665 }
 0x4f6   :  { %v668_v11 = vadd.f32 %v666_v9, %v2136_v29  ;;  %v809_v9 = vmul.f32 10.0, %v2158_v19 }
 0x4f8   :  { %v669_v13 = vmul.f32 0.5, %v668_v11  ;;  %v815_v0 = vsel %vm590_vm1, %v809_v9, -inf }
 0x4fa   :  { %v674_v42 = vmul.f32 %v669_v13, %v669_v13 }
 0x4fc   :  { %v682_v10 = vsel %vm588_vm0, %v674_v42, 0.0 }
 0x4fd   :  { %683 = vadd.xlane.f32.xlu0 %v682_v10 }
 0x4fe   :  { %v1358_v49 = vpop.eup %1357 }
 0x4ff   :  { %v915_v61 = vmul.f32 %v1358_v49, %v903_v50 }
 0x501   :  { %v918_v31 = vsel %vm590_vm1, %v915_v61, 0.0 }
 0x502   :  { %v919_v33 = vrot.slane %v918_v31, 4 }
 0x504   :  { %v920_v2 = vadd.f32 %v919_v33, %v918_v31 }
 0x506   :  { %v921_v28 = vrot.slane %v920_v2, 2 }
 0x508   :  { %v922_v44 = vadd.f32 %v921_v28, %v920_v2  ;;  %v808_v2 = vmul.f32 10.0, %v2161_v27 }
 0x50a   :  { %v923_v58 = vrot.slane %v922_v44, 1  ;;  %v812_v28 = vsel %vm590_vm1, %v808_v2, -inf }
 0x50c   :  { %v924_v1 = vadd.f32 %v923_v58, %v922_v44 }
 0x50e   :  { %v932_v6 = vmax.f32 %v924_v1, 1e-12 }
 0x510   :  { %1359 = vrcp.f32 %v932_v6 }
 0x51a   :  { %v1360_v15 = vpop.eup %1359 }
 0x51b   :  { %v935_v18 = vmul.f32 %v1360_v15, %v915_v61 }
 0x51d   :  { %v938_v29 = vsel %vm590_vm1, %v935_v18, 0.0 }
 0x51e   :  { %939 = vadd.xlane.f32.xlu0 %v938_v29 }
 0x526   :  { %v687_v8 = vpop.xlane.xlu1 %686 }
 0x527   :  { %v691_v17 = vmax.f32 %v687_v8, 1e-24 }
 0x54b   :  { %v985_v49 = vpop.permute.xlu1 %984 }
 0x54c   :  { %vm986_vm7 = vcmp.eq.s32.totalorder %v985_v49, 1 }
 0x576   :  { %v943_v54 = vpop.xlane.xlu0 %942 }
 0x577   :  { %v945_v53 = vmax.f32 %v943_v54, 1e-12 }
 0x579   :  { %1361 = vrcp.f32 %v945_v53 }
 0x57a   :  { %1363 = vrsqrt.f32 %v691_v17 }
 0x583   :  { %v1362_v3 = vpop.eup %1361 }
 0x584   :  { %v949_v7 = vmul.f32 %v1362_v3, %v937_v45  ;;  %v1364_v51 = vpop.eup %1363 }
 0x585   :  { %v699_v63 = vmul.f32 %v1364_v51, %v2190_v56 }
 0x586   :  { %v957_v12 = vsel %vm590_vm1, %v949_v7, 0.0 }
 0x587   :  { %v958_v16 = vrot.slane %v957_v12, 4 }
 0x589   :  { %v959_v25 = vadd.f32 %v958_v16, %v957_v12 }
 0x58a   :  { %v684_v26 = vpop.xlane.xlu0 %683 }
 0x58b   :  { %v690_v30 = vmax.f32 %v684_v26, 1e-24  ;;  %v960_v34 = vrot.slane %v959_v25, 2 }
 0x58d   :  { %1365 = vrsqrt.f32 %v690_v30  ;;  %v961_v38 = vadd.f32 %v960_v34, %v959_v25 }
 0x58f   :  { %v962_v39 = vrot.slane %v961_v38, 1 }
 0x591   :  { %v963_v43 = vadd.f32 %v962_v39, %v961_v38 }
 0x593   :  { %v965_v50 = vmax.f32 %v963_v43, 1e-12 }
 0x595   :  { %1367 = vrcp.f32 %v965_v50 }
 0x597   :  { %v1366_v52 = vpop.eup %1365 }
 0x598   :  { %v698_v62 = vmul.f32 %v1366_v52, %v669_v13 }
 0x59a   :  { %1313 = vmatprep.mubr.msk.f32.mxu1 %vm588_vm0, %v698_v62 }
 0x59b   :  { %1314 = vmatmul.mubr.msk.f32.gmra.mrb[18].mxu1 %vm588_vm0, %v699_v63 }
 0x59f   :  { %v1368_v5 = vpop.eup %1367 }
 0x5a0   :  { %v969_v14 = vmul.f32 %v1368_v5, %v949_v7 }
 0x5a2   :  { %v973_v20 = vsel %vm590_vm1, %v969_v14, 0.0 }
 0x5a3   :  { %974 = vadd.xlane.f32.xlu0 %v973_v20 }
 0x5ab   :  { %v940_v37 = vpop.xlane.xlu0 %939 }
 0x5ac   :  { %v944_v41 = vmax.f32 %v940_v37, 1e-12 }
 0x5ae   :  { %1369 = vrcp.f32 %v944_v41 }
 0x5b8   :  { %v1370_v55 = vpop.eup %1369 }
 0x5b9   :  { %34 = vperm.xlu0 %1333, %v32_v46   ;;  %v947_v60 = vmul.f32 %v1370_v55, %v935_v18 }
 0x5bb   :  { %v950_v56 = vsel %vm590_vm1, %v947_v60, 0.0 }
 0x5bc   :  { %v951_v4 = vrot.slane %v950_v56, 4 }
 0x5be   :  { %v952_v21 = vadd.f32 %v951_v4, %v950_v56 }
 0x5c0   :  { %v953_v22 = vrot.slane %v952_v21, 2 }
 0x5c2   :  { %v954_v23 = vadd.f32 %v953_v22, %v952_v21 }
 0x5c4   :  { %v955_v24 = vrot.slane %v954_v23, 1 }
 0x5c6   :  { %v956_v45 = vadd.f32 %v955_v24, %v954_v23 }
 0x5c8   :  { %v964_v47 = vmax.f32 %v956_v45, 1e-12 }
 0x5ca   :  { %1371 = vrcp.f32 %v964_v47 }
 0x5d4   :  { %v1372_v48 = vpop.eup %1371 }
 0x5d5   :  { %v967_v57 = vmul.f32 %v1372_v48, %v947_v60 }
 0x5d7   :  { %v970_v11 = vsel %vm590_vm1, %v967_v57, 0.0 }
 0x5d8   :  { %971 = vadd.xlane.f32.xlu0 %v970_v11 }
 0x5dc   :  { %816 = vmax.xlane.f32.xlu0 %v815_v0 }
 0x630   :  { %v975_v13 = vpop.xlane.xlu0 %974 }
 0x631   :  { %v977_v42 = vmax.f32 %v975_v13, 1e-12 }
 0x633   :  { %1373 = vrcp.f32 %v977_v42 }
 0x638   :  { %v35_v10 = vpop.permute.xlu0 %34 }
 0x639   :  { %vm36_vm6 = vcmp.eq.s32.totalorder %v2170_v59, %v35_v10 }
 0x63a   :  { %v1110_v31 = vsel %vm36_vm6, 1.0, %v1407_v40 }
 0x63d   :  { %v1374_v61 = vpop.eup %1373 }
 0x63e   :  { %v981_v33 = vmul.f32 %v1374_v61, %v969_v14 }
 0x640   :  { %v2216_v19 = vsel %vm986_vm7, %v1110_v31, %v981_v33 }
 0x641   :  { %990 = vrot.lane.b32.xlu1 %v2216_v19, %s1411_s7 }
 0x665   :  { %813 = vmax.xlane.f32.xlu1 %v812_v28  ;;  %v972_v44 = vpop.xlane.xlu0 %971 }
 0x666   :  { %v976_v58 = vmax.f32 %v972_v44, 1e-12 }
 0x668   :  { %1375 = vrcp.f32 %v976_v58 }
 0x669   :  { %v817_v59 = vpop.xlane.xlu0 %816 }
 0x66a   :  { %v2221_v1 = vsub.f32 %v809_v9, %v817_v59 }
 0x66c   :  { %v830_v40 = vmul.f32 1.442695, %v2221_v1 }
 0x66e   :  { %1377 = vpow2.f32 %v830_v40  ;;  %v1315_v6 = vpop.f32.mrb[18].mxu1 }
 0x66f   :  { %v799_v15 = vpop.f32.mrb[19].mxu1  ;;  %v811_v35 = vmul.f32 10.0, %v1315_v6 }
 0x670   :  { %v810_v18 = vmul.f32 10.0, %v799_v15 }
 0x671   :  { %v821_v53 = vsel %vm590_vm1, %v811_v35, -inf }
 0x672   :  { %v1376_v29 = vpop.eup %1375  ;;  %v818_v36 = vsel %vm590_vm1, %v810_v18, -inf }
 0x673   :  { %819 = vmax.xlane.f32.xlu0 %v818_v36  ;;  %v979_v27 = vmul.f32 %v1376_v29, %v967_v57 }
 0x675   :  { %v987_v54 = vsel %vm986_vm7, %v1110_v31, %v979_v27 }
 0x677   :  { %822 = vmax.xlane.f32.xlu0 %v821_v53 }
 0x678   :  { %v1378_v3 = vpop.eup %1377 }
 0x679   :  { %v839_v7 = vsel %vm590_vm1, %v1378_v3, 0.0 }
 0x67b   :  { %840 = vadd.xlane.f32.xlu0 %v839_v7 }
 0x6b3   :  { %v991_v8 = vpop.permute.xlu1 %990 }
 0x6b4   :  { %v993_v12 = vsel %vm590_vm1, %v987_v54, %v991_v8 }
 0x6b5   :  { %1317 = vmatpush3.msra.mxu0 %v993_v12 }
 0x6b6   :  { %1319 = vmatmul.mubr.msk.f32.vlgmr.msra.gmra.mrb[18].mxu0 %vm590_vm1, %v2174_v32 }
 0x6f2   :  { %v814_v16 = vpop.xlane.xlu1 %813 }
 0x6f3   :  { %v824_v17 = vsub.f32 %v808_v2, %v814_v16 }
 0x6f5   :  { %v828_v25 = vmul.f32 1.442695, %v824_v17 }
 0x6f7   :  { %1379 = vpow2.f32 %v828_v25 }
 0x700   :  { %v820_v26 = vpop.xlane.xlu0 %819 }
 0x701   :  { %v1380_v30 = vpop.eup %1379  ;;  %v826_v34 = vsub.f32 %v810_v18, %v820_v26 }
 0x702   :  { %v836_v38 = vsel %vm590_vm1, %v1380_v30, 0.0 }
 0x703   :  { %v832_v39 = vmul.f32 1.442695, %v826_v34  ;;  %837 = vadd.xlane.f32.xlu1 %v836_v38 }
 0x704   :  { %v823_v43 = vpop.xlane.xlu0 %822 }
 0x705   :  { %1381 = vpow2.f32 %v832_v39  ;;  %v827_v50 = vsub.f32 %v811_v35, %v823_v43 }
 0x707   :  { %v834_v51 = vmul.f32 1.442695, %v827_v50 }
 0x708   :  { %v841_v37 = vpop.xlane.xlu0 %840 }
 0x709   :  { %1383 = vpow2.f32 %v834_v51 }
 0x70f   :  { %v1382_v52 = vpop.eup %1381 }
 0x710   :  { %v842_v62 = vsel %vm590_vm1, %v1382_v52, 0.0 }
 0x711   :  { %843 = vadd.xlane.f32.xlu1 %v842_v62 }
 0x713   :  { %v1384_v32 = vpop.eup %1383 }
 0x714   :  { %v845_v63 = vsel %vm590_vm1, %v1384_v32, 0.0 }
 0x715   :  { %846 = vadd.xlane.f32.xlu0 %v845_v63 }
 0x789   :  { %v1060_v5 = vpop.f32.mrb[18].mxu0 }
 0x78a   :  { %v1320_v14 = vpop.f32.mrb[19].mxu0  ;;  %1065 = vrot.lane.b32.xlu1 %v1060_v5, %s1412_s8  ;;  %v1070_v23 = vadd.f32 %v1060_v5, %v2216_v19 }
 0x78c   :  { %v1071_v57 = vmul.f32 0.5, %v1070_v23 }
 0x790   :  { %v838_v20 = vpop.xlane.xlu1 %837 }
 0x791   :  { %1385 = vlog2.f32 %v838_v20 }
 0x792   :  { %1387 = vlog2.f32 %v841_v37 }
 0x79b   :  { %v1386_v55 = vpop.eup %1385 }
 0x79c   :  { %v1388_v60 = vpop.eup %1387  ;;  %v849_v4 = vmul.f32 0.6931472, %v1386_v55 }
 0x79d   :  { %v851_v21 = vmul.f32 0.6931472, %v1388_v60 }
 0x79e   :  { %v844_v41 = vpop.xlane.xlu1 %843  ;;  %v856_v24 = vsub.f32 %v824_v17, %v849_v4 }
 0x79f   :  { %1389 = vlog2.f32 %v844_v41  ;;  %v857_v45 = vsub.f32 %v2221_v1, %v851_v21 }
 0x7a0   :  { %v1072_v9 = vmul.f32 %v2216_v19, %v856_v24 }
 0x7a1   :  { %v1073_v11 = vmul.f32 %v987_v54, %v857_v45 }
 0x7a2   :  { %v847_v46 = vpop.xlane.xlu0 %846  ;;  %v1076_v49 = vsel %vm590_vm1, %v1072_v9, 0.0 }
 0x7a3   :  { %1391 = vlog2.f32 %v847_v46  ;;  %v1077_v33 = vsel %vm590_vm1, %v1073_v11, 0.0 }
 0x7a4   :  { %v1078_v28 = vadd.f32 %v1077_v33, %v1076_v49 }
 0x7a9   :  { %v1390_v56 = vpop.eup %1389 }
 0x7aa   :  { %v853_v22 = vmul.f32 0.6931472, %v1390_v56 }
 0x7ac   :  { %v858_v47 = vsub.f32 %v826_v34, %v853_v22 }
 0x7ad   :  { %v1392_v48 = vpop.eup %1391 }
 0x7ae   :  { %v855_v0 = vmul.f32 0.6931472, %v1392_v48  ;;  %v1074_v13 = vmul.f32 %v1071_v57, %v858_v47 }
 0x7b0   :  { %v859_v61 = vsub.f32 %v827_v50, %v855_v0  ;;  %v1079_v2 = vsel %vm590_vm1, %v1074_v13, 0.0 }
 0x7b1   :  { %v1080_v58 = vadd.f32 %v1079_v2, %v1078_v28 }
 0x7fc   :  { %v1066_v42 = vpop.permute.xlu1 %1065 }
 0x7fd   :  { %v1068_v10 = vadd.f32 %v1066_v42, %v987_v54 }
 0x7ff   :  { %v1069_v31 = vmul.f32 0.5, %v1068_v10 }
 0x801   :  { %v1075_v44 = vmul.f32 %v1069_v31, %v859_v61 }
 0x803   :  { %v1081_v59 = vsel %vm590_vm1, %v1075_v44, 0.0 }
 0x804   :  { %v1082_v1 = vadd.f32 %v1081_v59, %v1080_v58 }
 0x806   :  { %1083 = vadd.xlane.f32.xlu0 %v1082_v1 }
 0x893   :  { %v1084_v19 = vpop.xlane.xlu0 %1083 }
 0x894   :  { %v1085_v40 = vrot.slane %v1084_v19, 4 }
 0x896   :  { %v1086_v6 = vadd.f32 %v1085_v40, %v1084_v19 }
 0x898   :  { %v1087_v15 = vrot.slane %v1086_v6, 2 }
 0x89a   :  { %v1088_v18 = vadd.f32 %v1087_v15, %v1086_v6 }
 0x89c   :  { %v1089_v29 = vrot.slane %v1088_v18, 1 }
 0x89e   :  { %v1090_v35 = vadd.f32 %v1089_v29, %v1088_v18 }
 0x8a0   :  { %1321 = vpush %v1090_v35 }
 0x8d1   :  { %s1322_s9 = spop %1321 }
 0x8d2   :  { %s1092_s10 = ssub.f32 0.0, %s1322_s9 }
 0x8d4   :  { %s1093_s11 = smul.f32 0.0625, %s1092_s10 }
 0x8d6   :  { %1095 = sst [smem:[#allocation2]] %s1093_s11 }
 0x8d7   :  { %1402 = shalt.err (!%p1399_p2)
}
 0x8d8   :  { %s1413_s0 = smov [#allocation2]  }
 0x8d9   :  { %1103 = dma.smem_to_hbm %s1413_s0, 16, %s2258_s5, [#allocation3]  }
 0x8da   :  { %1403 = dma.done.wait [#allocation3], 16  }
 0x8db   :  { %1404 = vsyncadd [#allocation3], 4294967280 }
 0x8dc   :  { %1107 = sfence }
 0x8dd   :  { %1108 = vsyncpa [#allocation3], 1 }

</bundles_post_ra>
